<compile_context>
chip_gen: v6e
topology: v6e:2x2x1
jax: 0.10.0
libtpu: 0.0.40
codegen_flags: <defaults>
</compile_context>

<pallas_src>
import math
import functools

import jax
import jax.numpy as jnp
from jax.experimental import pallas as pl
from jax.experimental.pallas import tpu as pltpu

F32 = jnp.float32
BF16 = jnp.bfloat16
NEG = -100000.0      # Python float (NOT a jnp scalar) -> no captured kernel constant
BN_EPS = 1e-5
MXU_BF16 = True      # bf16 MXU operands (f32 accumulation) for large, non-recurrent matmuls


def _vmem_specs(n):
    return [pl.BlockSpec(memory_space=pltpu.MemorySpace.VMEM) for _ in range(n)]


def _vmem_limit(arrays, out_shapes=()):
    """Raise the scoped-VMEM limit from the actual buffer sizes (clamped to 64 MiB
    so it stays valid on v7x's 64 MiB physical VMEM)."""
    total = 0
    for a in tuple(arrays) + tuple(out_shapes):
        total += math.prod(a.shape) * jnp.dtype(a.dtype).itemsize
    est = 4 * total + (8 << 20)
    return int(max(32 << 20, min(est, 64 << 20)))


def _mm(a, w):
    """2-D matmul; optionally narrows both operands to bf16 for the MXU while
    keeping f32 accumulation.  Elementwise math stays f32 (v5e VPU has no bf16)."""
    if MXU_BF16:
        a = a.astype(BF16)
        w = w.astype(BF16)
    return jnp.dot(a, w, preferred_element_type=F32)


def _softmax(x, axis):
    m = jnp.max(x, axis=axis, keepdims=True)
    e = jnp.exp(x - m)
    # reciprocal on the EUP slot instead of a VALU divide (only feeds attention
    # readouts, never the returned log-probs).
    return e * pl.reciprocal(jnp.sum(e, axis=axis, keepdims=True), approx=True)


# ===================== kernel 1: encoder + _prepare (fused) =====================
def _encode_prepare_kernel(x_ref, emb_w_ref,
                           wqkv_ref, bqkv_ref, wo_ref, bo_ref,
                           w1_ref, b1_ref, w2_ref, b2_ref,
                           gamma_ref, beta_ref,
                           mem_w_ref, mem_b_ref, h1_b_ref, h2_w_ref, h2_b_ref,
                           init_w_ref, vw_w_ref, vw_b_ref, hq_w_ref, hq_b_ref,
                           h_ref, query_ref, left_ref, *, n_head):
    B, S, in_dim = x_ref.shape
    E = emb_w_ref.shape[1]
    L = wqkv_ref.shape[0]
    d = E // n_head
    scale = 1.0 / math.sqrt(d)

    # GraphEmbedding: linear projection, no bias. Kept f32 (K=2 is tiny, and the
    # coordinates would lose precision in bf16).
    x2 = x_ref[...].reshape(B * S, in_dim)
    hf = jnp.dot(x2, emb_w_ref[...], preferred_element_type=F32)          # [B*S, E]

    for l in range(L):                                # static loop over att layers
        # Fused QKV: one [E, 3E] matmul -> 3x MXU lane utilization vs separate q/k/v.
        qkv = _mm(hf, wqkv_ref[l]) + bqkv_ref[l]                           # [B*S, 3E]

        def heads(base):
            # head-major [n_head*B, S, d] so all heads go through one batched einsum
            return jnp.concatenate(
                [qkv[:, base + hh * d: base + (hh + 1) * d].reshape(B, S, d)
                 for hh in range(n_head)], axis=0)
        qh, kh, vh = heads(0), heads(E), heads(2 * E)

        s = jnp.einsum('gqd,gkd->gqk', qh, kh, preferred_element_type=F32) * scale
        p = _softmax(s, axis=-1)
        o = jnp.einsum('gqk,gkd->gqd', p, vh, preferred_element_type=F32)  # [G, S, d]
        attn = jnp.concatenate(
            [o[hh * B:(hh + 1) * B] for hh in range(n_head)], axis=-1)     # [B, S, E]
        attn = attn.reshape(B * S, E)

        mha = _mm(attn, wo_ref[l]) + bo_ref[l]
        r1 = hf + mha                                                       # residual 1
        ff = jnp.maximum(_mm(r1, w1_ref[l]) + b1_ref[l], 0.0)
        ff = _mm(ff, w2_ref[l]) + b2_ref[l]
        r2 = r1 + ff                                                        # residual 2

        # BatchNorm1d, training-mode batch stats over the flattened B*S axis.
        # Two-pass (centered) variance to avoid E[x^2]-mean^2 cancellation.
        # NOTE: stats span the full batch -> this kernel must stay un-tiled over B.
        mean = jnp.mean(r2, axis=0, keepdims=True)
        xc = r2 - mean
        var = jnp.mean(xc * xc, axis=0, keepdims=True)
        hf = xc * (gamma_ref[l] * jax.lax.rsqrt(var + BN_EPS)) + beta_ref[l]

    # h is handed to the decoder as a 2-D [B*S, E] slab (no 3-D<->2-D relayout
    # at the kernel boundary).
    h_ref[...] = hf

    # ----- _prepare tail (h_context_embed output is dead in the torch forward -> dropped) -----
    left = (jnp.dot(hf, mem_w_ref[...], preferred_element_type=F32) + mem_b_ref[...])
    left = left.reshape(B, S, E).sum(axis=1)                                # [B, E]
    left_ref[...] = left

    # chosen_vector == 0  =>  h1_transform(tanh(0)) is exactly the h1 bias.
    h2q = jnp.dot(jnp.tanh(left), h2_w_ref[...], preferred_element_type=F32) + h2_b_ref[...]
    vw = jnp.dot(init_w_ref[...], vw_w_ref[...], preferred_element_type=F32) + vw_b_ref[...]
    pre = h2q + h1_b_ref[...] + vw                                          # [B, E]
    query_ref[...] = jnp.dot(pre, hq_w_ref[...], preferred_element_type=F32) + hq_b_ref[...]


def pallas_encode_prepare(inputs, params, n_head):
    B, S, _ = inputs.shape
    E = params["emb_w"].shape[1]

    # Fuse q|k|v projection weights once at the wrapper level.
    w_qkv = jnp.concatenate([params["wq"], params["wk"], params["wv"]], axis=-1)  # [L, E, 3E]
    b_qkv = jnp.concatenate([params["bq"], params["bk"], params["bv"]], axis=-1)  # [L, 1, 3E]

    kern = functools.partial(_encode_prepare_kernel, n_head=n_head)
    args = (inputs, params["emb_w"], w_qkv, b_qkv,
            params["wo"], params["bo"], params["w1"], params["b1"],
            params["w2"], params["b2"], params["gamma"], params["beta"],
            params["memory_w"], params["memory_b"], params["h1_b"],
            params["h2_w"], params["h2_b"], params["init_w"],
            params["v_weight_w"], params["v_weight_b"],
            params["h_query_w"], params["h_query_b"])
    out_shapes = (jax.ShapeDtypeStruct((B * S, E), F32),   # h (2-D, batch-major rows)
                  jax.ShapeDtypeStruct((B, E), F32),       # query
                  jax.ShapeDtypeStruct((B, E), F32))       # left_vector
    return pl.pallas_call(
        kern,
        out_shape=out_shapes,
        in_specs=_vmem_specs(len(args)),
        out_specs=tuple(_vmem_specs(3)),
        compiler_params=pltpu.CompilerParams(
            vmem_limit_bytes=_vmem_limit(args, out_shapes)),
    )(*args)


# ===================== kernel 2: fused autoregressive decode ====================
def _decode_kernel(h_ref, q0_ref, left0_ref,
                   gwq_ref, gbq_ref, wkvp_ref, bkvp_ref, gwo_ref, gbo_ref,
                   pwq_ref, pbq_ref, wcm_ref, bcm_ref, wh12v_ref, bh12v_ref,
                   hqw_ref, hqb_ref,
                   logp_ref, idx_ref, *, n_head, C):
    Bt, S = logp_ref.shape
    E = q0_ref.shape[1]
    Hd = gwq_ref.shape[1]
    d = Hd // n_head
    g_scale = 1.0 / math.sqrt(d)      # Glimpse: single_dim = hidden // n_head
    p_scale = 1.0 / math.sqrt(Hd)     # Pointer: n_head == 1 -> single_dim = hidden

    hf = h_ref[...]                   # [Bt*S, E]
    h3 = hf.reshape(Bt, S, E)         # leading-dim split only (S % 8 == 0 at demo)

    # ----- step-invariant K/V projections: ONE fused [E, 3*Hd] matmul, hoisted -----
    kvp = _mm(hf, wkvp_ref[...]) + bkvp_ref[...]            # [Bt*S, 3Hd] f32
    kvp3 = kvp.reshape(Bt, S, 3 * Hd)
    kg = kvp3[..., 0:Hd]                                    # glimpse K   [Bt, S, Hd]
    vg = kvp3[..., Hd:2 * Hd]                               # glimpse V
    kp = kvp3[..., 2 * Hd:3 * Hd]                           # pointer K

    gwq, gbq = gwq_ref[...], gbq_ref[...]
    gwo, gbo = gwo_ref[...], gbo_ref[...]
    pwq, pbq = pwq_ref[...], pbq_ref[...]
    wcm, bcm = wcm_ref[...], bcm_ref[...]
    wh12v, bh12v = wh12v_ref[...], bh12v_ref[...]
    hqw, hqb = hqw_ref[...], hqb_ref[...]

    # Block-diagonal head-sum / head-expand indicator matrices built once from iota.
    # They replace per-step per-head slice+concat relayouts with two tiny matmuls
    # and let the visited-mask broadcast over the head axis with no copy.
    r = jax.lax.broadcasted_iota(jnp.int32, (Hd, n_head), 0)
    c = jax.lax.broadcasted_iota(jnp.int32, (Hd, n_head), 1)
    hd_sum = (r // d == c).astype(F32)                      # [Hd, H]
    rT = jax.lax.broadcasted_iota(jnp.int32, (n_head, Hd), 0)
    cT = jax.lax.broadcasted_iota(jnp.int32, (n_head, Hd), 1)
    hd_exp = (cT // d == rT).astype(F32)                    # [H, Hd]

    lane_s = jax.lax.broadcasted_iota(jnp.int32, (Bt, S), 1)
    lane_s_f = lane_s.astype(F32)
    lane_2e = jax.lax.broadcasted_iota(jnp.int32, (1, 2 * E), 1)
    pm_sign = jnp.where(lane_2e < E, 1.0, -1.0).astype(F32)  # [+1.. | -1..] over 2E lanes

    def step(t, carry):
        query, cv_lv, mask, logp_acc, idx_acc = carry

        # ---- Glimpse (multi-head attention readout over h, masked) ----
        qg = jnp.dot(query, gwq, preferred_element_type=F32) + gbq          # [Bt, Hd]
        prod = qg[:, None, :] * kg                                          # [Bt, S, Hd]
        s = jnp.dot(prod.reshape(Bt * S, Hd), hd_sum,
                    preferred_element_type=F32).reshape(Bt, S, n_head) * g_scale
        s = jnp.where(mask[:, :, None] > 0.5, NEG, s)                       # broadcast, no copy
        alpha = _softmax(s, axis=1)                                         # softmax over keys S
        a_exp = jnp.dot(alpha.reshape(Bt * S, n_head), hd_exp,
                        preferred_element_type=F32).reshape(Bt, S, Hd)
        glimpse = jnp.sum(a_exp * vg, axis=1)                               # [Bt, Hd]
        n_query = jnp.dot(glimpse, gwo, preferred_element_type=F32) + gbo   # [Bt, E]

        # ---- Pointer (single head, C*tanh-clipped, masked) ----
        pq = jnp.dot(n_query, pwq, preferred_element_type=F32) + pbq        # [Bt, Hd]
        plog = jnp.sum(pq[:, None, :] * kp, axis=-1) * p_scale              # [Bt, S]
        plog = C * jnp.tanh(plog)
        plog = jnp.where(mask > 0.5, NEG, plog)

        # ---- argmax directly on the masked logits; exact log-prob via logsumexp ----
        pmax = jnp.max(plog, axis=-1, keepdims=True)                        # [Bt, 1]
        cand = jnp.where(plog >= pmax, lane_s_f, float(S))
        chosen_f = jnp.min(cand, axis=-1, keepdims=True)                    # first max index
        onehot = (lane_s_f == chosen_f).astype(F32)                         # [Bt, S]
        lse = pmax + jnp.log(jnp.sum(jnp.exp(plog - pmax), axis=-1, keepdims=True))
        logp = jnp.sum(plog * onehot, axis=-1, keepdims=True) - lse         # [Bt, 1] exact

        logp_acc = jnp.where(lane_s == t, logp, logp_acc)
        idx_acc = jnp.where(lane_s == t, chosen_f.astype(jnp.int32), idx_acc)
        mask = jnp.maximum(mask, onehot)

        # ---- per-step query update (small matmuls fused) ----
        chosen_hs = jnp.sum(onehot[:, :, None] * h3, axis=1)                # gather via one-hot [Bt, E]
        # chosen_transform | memory_transform in one [E, 2E] matmul; state is kept
        # packed as [chosen_vec | left_vec] and updated with a +/- sign vector.
        cm = jnp.dot(chosen_hs, wcm, preferred_element_type=F32) + bcm      # [Bt, 2E]
        cv_lv = cv_lv + cm * pm_sign
        # h1(tanh(cv)) + h2(tanh(lv)) + v_weight(chosen_hs) in one [3E, E] matmul.
        pre = jnp.concatenate([jnp.tanh(cv_lv), chosen_hs], axis=1)         # [Bt, 3E]
        pre = jnp.dot(pre, wh12v, preferred_element_type=F32) + bh12v       # [Bt, E]
        query = jnp.dot(pre, hqw, preferred_element_type=F32) + hqb

        return query, cv_lv, mask, logp_acc, idx_acc

    init = (q0_ref[...],
            jnp.concatenate([jnp.zeros((Bt, E), F32), left0_ref[...]], axis=1),
            jnp.zeros((Bt, S), F32),
            jnp.zeros((Bt, S), F32),
            jnp.zeros((Bt, S), jnp.int32))
    # Rolled loop: code size / vreg pressure independent of S; one dense store at end.
    _, _, _, logp_acc, idx_acc = jax.lax.fori_loop(0, S, step, init)
    logp_ref[...] = logp_acc
    idx_ref[...] = idx_acc


def _batch_tile(B):
    if B <= 8 or B % 8 != 0:
        return B
    for cand in (256, 128, 64, 32, 16, 8):
        if B % cand == 0:
            return cand
    return B


def pallas_decode(h2d, query, left_vector, params, n_head, C):
    B, E = query.shape
    S = h2d.shape[0] // B
    dec = params["dec"]

    # Wrapper-level weight fusions (done once, outside the kernels).
    w_kvp = jnp.concatenate([dec["g_wk"], dec["g_wv"], dec["p_wk"]], axis=-1)    # [E, 3Hd]
    b_kvp = jnp.concatenate([dec["g_bk"], dec["g_bv"], dec["p_bk"]], axis=-1)
    w_cm = jnp.concatenate([params["chosen_w"], params["memory_w"]], axis=-1)    # [E, 2E]
    b_cm = jnp.concatenate([params["chosen_b"], params["memory_b"]], axis=-1)
    w_h12v = jnp.concatenate([params["h1_w"], params["h2_w"], params["v_weight_w"]], axis=0)  # [3E, E]
    b_h12v = params["h1_b"] + params["h2_b"] + params["v_weight_b"]

    bt = _batch_tile(B)
    grid = (B // bt,)
    kern = functools.partial(_decode_kernel, n_head=n_head, C=float(C))

    weights = (dec["g_wq"], dec["g_bq"], w_kvp, b_kvp, dec["g_wo"], dec["g_bo"],
               dec["p_wq"], dec["p_bq"], w_cm, b_cm, w_h12v, b_h12v,
               params["h_query_w"], params["h_query_b"])
    args = (h2d, query, left_vector) + weights

    in_specs = [
        pl.BlockSpec((bt * S, E), lambda b: (b, 0)),          # h (rows are batch-major)
        pl.BlockSpec((bt, E), lambda b: (b, 0)),              # initial query
        pl.BlockSpec((bt, E), lambda b: (b, 0)),              # initial left_vector
    ] + [pl.BlockSpec(w.shape, lambda b: (0, 0)) for w in weights]   # weights stay resident

    out_specs = (pl.BlockSpec((bt, S), lambda b: (b, 0)),
                 pl.BlockSpec((bt, S), lambda b: (b, 0)))
    out_shapes = (jax.ShapeDtypeStruct((B, S), F32),          # log-probs
                  jax.ShapeDtypeStruct((B, S), jnp.int32))    # chosen indices

    return pl.pallas_call(
        kern,
        out_shape=out_shapes,
        grid=grid,
        in_specs=in_specs,
        out_specs=out_specs,
        compiler_params=pltpu.CompilerParams(
            dimension_semantics=("parallel",),                # batch shards across TCs
            vmem_limit_bytes=_vmem_limit(args, out_shapes)),
    )(*args)


# ================================ parameters ====================================
def init_params(key, input_dim, E, Hd, n_head, n_layers=2):
    keys = iter(jax.random.split(key, 128))
    nk = lambda: next(keys)

    def u(shape, bound):
        return jax.random.uniform(nk(), shape, F32, minval=-bound, maxval=bound)

    def linear(in_f, out_f):
        b = 1.0 / math.sqrt(in_f)
        return u((in_f, out_f), b), u((1, out_f), b)

    def stacked(in_f, out_f):
        ws, bs = [], []
        for _ in range(n_layers):
            w, b = linear(in_f, out_f)
            ws.append(w)
            bs.append(b)
        return jnp.stack(ws), jnp.stack(bs)

    p = {}
    # GraphEmbedding: linear projection, no bias (reconstructed; see TODO at top).
    p["emb_w"] = u((input_dim, E), 1.0 / math.sqrt(E))

    # att_layer stack: MHA q/k/v/out proj, feed-forward, BatchNorm affine — stacked over layers.
    p["wq"], p["bq"] = stacked(E, E)
    p["wk"], p["bk"] = stacked(E, E)
    p["wv"], p["bv"] = stacked(E, E)
    p["wo"], p["bo"] = stacked(E, E)
    p["w1"], p["b1"] = stacked(E, Hd)
    p["w2"], p["b2"] = stacked(Hd, E)
    # Normalization re-initializes its affine params uniformly in the torch code.
    # Normalization(feed_forward_hidden) applied to E-dim features requires E == Hd.
    bn = 1.0 / math.sqrt(Hd)
    p["gamma"] = u((n_layers, 1, E), bn)
    p["beta"] = u((n_layers, 1, E), bn)

    p["init_w"] = u((1, E), 0.1)
    for name in ["v_weight", "h_query", "memory", "chosen", "h1", "h2"]:
        w, b = linear(E, E)
        p[name + "_w"], p[name + "_b"] = w, b
    # NOTE: h_context_embed exists in the torch module but its output (h_bar) is
    # never used by forward() -> dead compute, dropped here.

    dec = {}
    dec["g_wq"], dec["g_bq"] = linear(E, Hd)     # Glimpse
    dec["g_wk"], dec["g_bk"] = linear(E, Hd)
    dec["g_wv"], dec["g_bv"] = linear(E, Hd)
    dec["g_wo"], dec["g_bo"] = linear(Hd, E)
    dec["p_wq"], dec["p_bq"] = linear(E, Hd)     # Pointer
    dec["p_wk"], dec["p_bk"] = linear(E, Hd)
    p["dec"] = dec
    return p


# ================================== forward =====================================
def attention_tsp_forward(params, inputs, n_head=4, C=10):
    """AttentionTSP.forward(inputs, argmax=True). Returns (logprobs, indices)."""
    h2d, query, left_vector = pallas_encode_prepare(inputs, params, n_head)
    logprobs, indices = pallas_decode(h2d, query, left_vector, params, n_head, C)
    return logprobs, indices


if __name__ == "__main__":
    B, S = 2, 8
    input_dim = 2
    E = 32          # embedding_size
    Hd = 32         # hidden_size (== E, required by the original Normalization usage)
    n_head = 4
    C = 10

    key = jax.random.PRNGKey(0)
    k_in, k_p = jax.random.split(key)
    inputs = jax.random.uniform(k_in, (B, S, input_dim), F32)   # [batch, seq_len, 2]
    params = init_params(k_p, input_dim, E, Hd, n_head)

    logprobs, indices = attention_tsp_forward(params, inputs, n_head=n_head, C=C)
    jax.block_until_ready((logprobs, indices))
    assert logprobs.shape == (B, S) and indices.shape == (B, S)
    assert indices.dtype == jnp.int32
    assert bool(jnp.all(jnp.isfinite(logprobs)))
    print("KERNEL_OK")
</pallas_src>

<mosaic_0001>
module attributes {stable_mosaic.version = 11 : i64} {
  func.func @_encode_prepare_kernel(%arg0: memref<2x8x2xf32, #tpu.memory_space<vmem>>, %arg1: memref<2x32xf32, #tpu.memory_space<vmem>>, %arg2: memref<2x32x96xf32, #tpu.memory_space<vmem>>, %arg3: memref<2x1x96xf32, #tpu.memory_space<vmem>>, %arg4: memref<2x32x32xf32, #tpu.memory_space<vmem>>, %arg5: memref<2x1x32xf32, #tpu.memory_space<vmem>>, %arg6: memref<2x32x32xf32, #tpu.memory_space<vmem>>, %arg7: memref<2x1x32xf32, #tpu.memory_space<vmem>>, %arg8: memref<2x32x32xf32, #tpu.memory_space<vmem>>, %arg9: memref<2x1x32xf32, #tpu.memory_space<vmem>>, %arg10: memref<2x1x32xf32, #tpu.memory_space<vmem>>, %arg11: memref<2x1x32xf32, #tpu.memory_space<vmem>>, %arg12: memref<32x32xf32, #tpu.memory_space<vmem>>, %arg13: memref<1x32xf32, #tpu.memory_space<vmem>>, %arg14: memref<1x32xf32, #tpu.memory_space<vmem>>, %arg15: memref<32x32xf32, #tpu.memory_space<vmem>>, %arg16: memref<1x32xf32, #tpu.memory_space<vmem>>, %arg17: memref<1x32xf32, #tpu.memory_space<vmem>>, %arg18: memref<32x32xf32, #tpu.memory_space<vmem>>, %arg19: memref<1x32xf32, #tpu.memory_space<vmem>>, %arg20: memref<32x32xf32, #tpu.memory_space<vmem>>, %arg21: memref<1x32xf32, #tpu.memory_space<vmem>>, %arg22: memref<16x32xf32, #tpu.memory_space<vmem>>, %arg23: memref<2x32xf32, #tpu.memory_space<vmem>>, %arg24: memref<2x32xf32, #tpu.memory_space<vmem>>) attributes {dimension_semantics = [], scalar_prefetch = 0 : i64, scratch_operands = 0 : i64, tpu.core_type = #tpu.core_type<tc>} {
    %c0 = arith.constant 0 : index
    %c0_0 = arith.constant 0 : index
    %c0_1 = arith.constant 0 : index
    %0 = vector.load %arg0[%c0, %c0_0, %c0_1] : memref<2x8x2xf32, #tpu.memory_space<vmem>>, vector<2x8x2xf32>
    %1 = vector.shape_cast %0 : vector<2x8x2xf32> to vector<16x2xf32>
    %c0_2 = arith.constant 0 : index
    %c0_3 = arith.constant 0 : index
    %2 = vector.load %arg1[%c0_2, %c0_3] : memref<2x32xf32, #tpu.memory_space<vmem>>, vector<2x32xf32>
    %cst = arith.constant dense<0.000000e+00> : vector<16x32xf32>
    %3 = tpu.matmul %1, %2, %cst {dimension_numbers = #tpu.dot_dimension_numbers<[1], [0], [0], [1], [0, 0, 1, 1], [], []>} : vector<16x2xf32>, vector<2x32xf32>, vector<16x32xf32> -> vector<16x32xf32>
    %c0_4 = arith.constant 0 : index
    %c0_5 = arith.constant 0 : index
    %c0_6 = arith.constant 0 : index
    %4 = vector.load %arg2[%c0_4, %c0_5, %c0_6] : memref<2x32x96xf32, #tpu.memory_space<vmem>>, vector<1x32x96xf32>
    %5 = vector.shape_cast %4 : vector<1x32x96xf32> to vector<32x96xf32>
    %6 = arith.truncf %3 : vector<16x32xf32> to vector<16x32xbf16>
    %7 = arith.truncf %5 : vector<32x96xf32> to vector<32x96xbf16>
    %cst_7 = arith.constant dense<0.000000e+00> : vector<16x96xf32>
    %8 = tpu.matmul %6, %7, %cst_7 {dimension_numbers = #tpu.dot_dimension_numbers<[1], [0], [0], [1], [0, 0, 1, 1], [], []>} : vector<16x32xbf16>, vector<32x96xbf16>, vector<16x96xf32> -> vector<16x96xf32>
    %c0_8 = arith.constant 0 : index
    %c0_9 = arith.constant 0 : index
    %c0_10 = arith.constant 0 : index
    %9 = vector.load %arg3[%c0_8, %c0_9, %c0_10] : memref<2x1x96xf32, #tpu.memory_space<vmem>>, vector<1x1x96xf32>
    %10 = vector.shape_cast %9 : vector<1x1x96xf32> to vector<1x96xf32>
    %11 = vector.broadcast %10 : vector<1x96xf32> to vector<16x96xf32>
    %12 = arith.addf %8, %11 : vector<16x96xf32>
    %13 = vector.extract_strided_slice %12 {offsets = [0, 0], sizes = [16, 8], strides = [1, 1]} : vector<16x96xf32> to vector<16x8xf32>
    %14 = vector.shape_cast %13 : vector<16x8xf32> to vector<2x8x8xf32>
    %15 = vector.extract_strided_slice %12 {offsets = [0, 8], sizes = [16, 8], strides = [1, 1]} : vector<16x96xf32> to vector<16x8xf32>
    %16 = vector.shape_cast %15 : vector<16x8xf32> to vector<2x8x8xf32>
    %17 = vector.extract_strided_slice %12 {offsets = [0, 16], sizes = [16, 8], strides = [1, 1]} : vector<16x96xf32> to vector<16x8xf32>
    %18 = vector.shape_cast %17 : vector<16x8xf32> to vector<2x8x8xf32>
    %19 = vector.extract_strided_slice %12 {offsets = [0, 24], sizes = [16, 8], strides = [1, 1]} : vector<16x96xf32> to vector<16x8xf32>
    %20 = vector.shape_cast %19 : vector<16x8xf32> to vector<2x8x8xf32>
    %21 = tpu.concatenate %14, %16, %18, %20 in 0 : vector<2x8x8xf32>, vector<2x8x8xf32>, vector<2x8x8xf32>, vector<2x8x8xf32> -> vector<8x8x8xf32>
    %22 = vector.extract_strided_slice %12 {offsets = [0, 32], sizes = [16, 8], strides = [1, 1]} : vector<16x96xf32> to vector<16x8xf32>
    %23 = vector.shape_cast %22 : vector<16x8xf32> to vector<2x8x8xf32>
    %24 = vector.extract_strided_slice %12 {offsets = [0, 40], sizes = [16, 8], strides = [1, 1]} : vector<16x96xf32> to vector<16x8xf32>
    %25 = vector.shape_cast %24 : vector<16x8xf32> to vector<2x8x8xf32>
    %26 = vector.extract_strided_slice %12 {offsets = [0, 48], sizes = [16, 8], strides = [1, 1]} : vector<16x96xf32> to vector<16x8xf32>
    %27 = vector.shape_cast %26 : vector<16x8xf32> to vector<2x8x8xf32>
    %28 = vector.extract_strided_slice %12 {offsets = [0, 56], sizes = [16, 8], strides = [1, 1]} : vector<16x96xf32> to vector<16x8xf32>
    %29 = vector.shape_cast %28 : vector<16x8xf32> to vector<2x8x8xf32>
    %30 = tpu.concatenate %23, %25, %27, %29 in 0 : vector<2x8x8xf32>, vector<2x8x8xf32>, vector<2x8x8xf32>, vector<2x8x8xf32> -> vector<8x8x8xf32>
    %31 = vector.extract_strided_slice %12 {offsets = [0, 64], sizes = [16, 8], strides = [1, 1]} : vector<16x96xf32> to vector<16x8xf32>
    %32 = vector.shape_cast %31 : vector<16x8xf32> to vector<2x8x8xf32>
    %33 = vector.extract_strided_slice %12 {offsets = [0, 72], sizes = [16, 8], strides = [1, 1]} : vector<16x96xf32> to vector<16x8xf32>
    %34 = vector.shape_cast %33 : vector<16x8xf32> to vector<2x8x8xf32>
    %35 = vector.extract_strided_slice %12 {offsets = [0, 80], sizes = [16, 8], strides = [1, 1]} : vector<16x96xf32> to vector<16x8xf32>
    %36 = vector.shape_cast %35 : vector<16x8xf32> to vector<2x8x8xf32>
    %37 = vector.extract_strided_slice %12 {offsets = [0, 88], sizes = [16, 8], strides = [1, 1]} : vector<16x96xf32> to vector<16x8xf32>
    %38 = vector.shape_cast %37 : vector<16x8xf32> to vector<2x8x8xf32>
    %39 = tpu.concatenate %32, %34, %36, %38 in 0 : vector<2x8x8xf32>, vector<2x8x8xf32>, vector<2x8x8xf32>, vector<2x8x8xf32> -> vector<8x8x8xf32>
    "tpu.trace_start"() <{level = 10 : i32, message = "gqd,gkd->gqk"}> : () -> ()
    %cst_11 = arith.constant dense<0.000000e+00> : vector<8x8x8xf32>
    %40 = tpu.matmul %21, %30, %cst_11 {dimension_numbers = #tpu.dot_dimension_numbers<[2], [2], [1], [1], [0, 0, 0, 1, 1, 1], [0], [0]>} : vector<8x8x8xf32>, vector<8x8x8xf32>, vector<8x8x8xf32> -> vector<8x8x8xf32>
    "tpu.trace_stop"() : () -> ()
    %cst_12 = arith.constant 0.353553385 : f32
    %41 = vector.broadcast %cst_12 : f32 to vector<8x8x8xf32>
    %42 = arith.mulf %40, %41 : vector<8x8x8xf32>
    %cst_13 = arith.constant dense<0xFF800000> : vector<8x8xf32>
    %43 = vector.multi_reduction <maximumf>, %42, %cst_13 [2] : vector<8x8x8xf32> to vector<8x8xf32>
    %44 = vector.shape_cast %43 : vector<8x8xf32> to vector<8x8x1xf32>
    %45 = vector.broadcast %44 : vector<8x8x1xf32> to vector<8x8x8xf32>
    %46 = arith.subf %42, %45 : vector<8x8x8xf32>
    %47 = math.exp %46 : vector<8x8x8xf32>
    %cst_14 = arith.constant dense<0.000000e+00> : vector<8x8xf32>
    %48 = vector.multi_reduction <add>, %47, %cst_14 [2] : vector<8x8x8xf32> to vector<8x8xf32>
    %49 = vector.shape_cast %48 : vector<8x8xf32> to vector<8x8x1xf32>
    %50 = tpu.reciprocal %49 {approx = true} : vector<8x8x1xf32> -> vector<8x8x1xf32>
    %51 = vector.broadcast %50 : vector<8x8x1xf32> to vector<8x8x8xf32>
    %52 = arith.mulf %47, %51 : vector<8x8x8xf32>
    "tpu.trace_start"() <{level = 10 : i32, message = "gqk,gkd->gqd"}> : () -> ()
    %cst_15 = arith.constant dense<0.000000e+00> : vector<8x8x8xf32>
    %53 = tpu.matmul %52, %39, %cst_15 {dimension_numbers = #tpu.dot_dimension_numbers<[2], [1], [1], [2], [0, 0, 0, 1, 1, 2], [0], [0]>} : vector<8x8x8xf32>, vector<8x8x8xf32>, vector<8x8x8xf32> -> vector<8x8x8xf32>
    "tpu.trace_stop"() : () -> ()
    %54 = vector.extract_strided_slice %53 {offsets = [0, 0, 0], sizes = [2, 8, 8], strides = [1, 1, 1]} : vector<8x8x8xf32> to vector<2x8x8xf32>
    %55 = vector.extract_strided_slice %53 {offsets = [2, 0, 0], sizes = [2, 8, 8], strides = [1, 1, 1]} : vector<8x8x8xf32> to vector<2x8x8xf32>
    %56 = vector.extract_strided_slice %53 {offsets = [4, 0, 0], sizes = [2, 8, 8], strides = [1, 1, 1]} : vector<8x8x8xf32> to vector<2x8x8xf32>
    %57 = vector.extract_strided_slice %53 {offsets = [6, 0, 0], sizes = [2, 8, 8], strides = [1, 1, 1]} : vector<8x8x8xf32> to vector<2x8x8xf32>
    %58 = tpu.concatenate %54, %55, %56, %57 in 2 : vector<2x8x8xf32>, vector<2x8x8xf32>, vector<2x8x8xf32>, vector<2x8x8xf32> -> vector<2x8x32xf32>
    %59 = vector.shape_cast %58 : vector<2x8x32xf32> to vector<16x32xf32>
    %c0_16 = arith.constant 0 : index
    %c0_17 = arith.constant 0 : index
    %c0_18 = arith.constant 0 : index
    %60 = vector.load %arg4[%c0_16, %c0_17, %c0_18] : memref<2x32x32xf32, #tpu.memory_space<vmem>>, vector<1x32x32xf32>
    %61 = vector.shape_cast %60 : vector<1x32x32xf32> to vector<32x32xf32>
    %62 = arith.truncf %59 : vector<16x32xf32> to vector<16x32xbf16>
    %63 = arith.truncf %61 : vector<32x32xf32> to vector<32x32xbf16>
    %cst_19 = arith.constant dense<0.000000e+00> : vector<16x32xf32>
    %64 = tpu.matmul %62, %63, %cst_19 {dimension_numbers = #tpu.dot_dimension_numbers<[1], [0], [0], [1], [0, 0, 1, 1], [], []>} : vector<16x32xbf16>, vector<32x32xbf16>, vector<16x32xf32> -> vector<16x32xf32>
    %c0_20 = arith.constant 0 : index
    %c0_21 = arith.constant 0 : index
    %c0_22 = arith.constant 0 : index
    %65 = vector.load %arg5[%c0_20, %c0_21, %c0_22] : memref<2x1x32xf32, #tpu.memory_space<vmem>>, vector<1x1x32xf32>
    %66 = vector.shape_cast %65 : vector<1x1x32xf32> to vector<1x32xf32>
    %67 = vector.broadcast %66 : vector<1x32xf32> to vector<16x32xf32>
    %68 = arith.addf %64, %67 : vector<16x32xf32>
    %69 = arith.addf %3, %68 : vector<16x32xf32>
    %c0_23 = arith.constant 0 : index
    %c0_24 = arith.constant 0 : index
    %c0_25 = arith.constant 0 : index
    %70 = vector.load %arg6[%c0_23, %c0_24, %c0_25] : memref<2x32x32xf32, #tpu.memory_space<vmem>>, vector<1x32x32xf32>
    %71 = vector.shape_cast %70 : vector<1x32x32xf32> to vector<32x32xf32>
    %72 = arith.truncf %69 : vector<16x32xf32> to vector<16x32xbf16>
    %73 = arith.truncf %71 : vector<32x32xf32> to vector<32x32xbf16>
    %cst_26 = arith.constant dense<0.000000e+00> : vector<16x32xf32>
    %74 = tpu.matmul %72, %73, %cst_26 {dimension_numbers = #tpu.dot_dimension_numbers<[1], [0], [0], [1], [0, 0, 1, 1], [], []>} : vector<16x32xbf16>, vector<32x32xbf16>, vector<16x32xf32> -> vector<16x32xf32>
    %c0_27 = arith.constant 0 : index
    %c0_28 = arith.constant 0 : index
    %c0_29 = arith.constant 0 : index
    %75 = vector.load %arg7[%c0_27, %c0_28, %c0_29] : memref<2x1x32xf32, #tpu.memory_space<vmem>>, vector<1x1x32xf32>
    %76 = vector.shape_cast %75 : vector<1x1x32xf32> to vector<1x32xf32>
    %77 = vector.broadcast %76 : vector<1x32xf32> to vector<16x32xf32>
    %78 = arith.addf %74, %77 : vector<16x32xf32>
    %cst_30 = arith.constant 0.000000e+00 : f32
    %79 = vector.broadcast %cst_30 : f32 to vector<16x32xf32>
    %80 = arith.maximumf %78, %79 : vector<16x32xf32>
    %c0_31 = arith.constant 0 : index
    %c0_32 = arith.constant 0 : index
    %c0_33 = arith.constant 0 : index
    %81 = vector.load %arg8[%c0_31, %c0_32, %c0_33] : memref<2x32x32xf32, #tpu.memory_space<vmem>>, vector<1x32x32xf32>
    %82 = vector.shape_cast %81 : vector<1x32x32xf32> to vector<32x32xf32>
    %83 = arith.truncf %80 : vector<16x32xf32> to vector<16x32xbf16>
    %84 = arith.truncf %82 : vector<32x32xf32> to vector<32x32xbf16>
    %cst_34 = arith.constant dense<0.000000e+00> : vector<16x32xf32>
    %85 = tpu.matmul %83, %84, %cst_34 {dimension_numbers = #tpu.dot_dimension_numbers<[1], [0], [0], [1], [0, 0, 1, 1], [], []>} : vector<16x32xbf16>, vector<32x32xbf16>, vector<16x32xf32> -> vector<16x32xf32>
    %c0_35 = arith.constant 0 : index
    %c0_36 = arith.constant 0 : index
    %c0_37 = arith.constant 0 : index
    %86 = vector.load %arg9[%c0_35, %c0_36, %c0_37] : memref<2x1x32xf32, #tpu.memory_space<vmem>>, vector<1x1x32xf32>
    %87 = vector.shape_cast %86 : vector<1x1x32xf32> to vector<1x32xf32>
    %88 = vector.broadcast %87 : vector<1x32xf32> to vector<16x32xf32>
    %89 = arith.addf %85, %88 : vector<16x32xf32>
    %90 = arith.addf %69, %89 : vector<16x32xf32>
    %cst_38 = arith.constant dense<0.000000e+00> : vector<32xf32>
    %91 = vector.multi_reduction <add>, %90, %cst_38 [0] : vector<16x32xf32> to vector<32xf32>
    %92 = vector.shape_cast %91 : vector<32xf32> to vector<1x32xf32>
    %cst_39 = arith.constant 1.600000e+01 : f32
    %93 = vector.broadcast %cst_39 : f32 to vector<1x32xf32>
    %94 = arith.divf %92, %93 : vector<1x32xf32>
    %95 = vector.broadcast %94 : vector<1x32xf32> to vector<16x32xf32>
    %96 = arith.subf %90, %95 : vector<16x32xf32>
    %97 = arith.mulf %96, %96 : vector<16x32xf32>
    %cst_40 = arith.constant dense<0.000000e+00> : vector<32xf32>
    %98 = vector.multi_reduction <add>, %97, %cst_40 [0] : vector<16x32xf32> to vector<32xf32>
    %99 = vector.shape_cast %98 : vector<32xf32> to vector<1x32xf32>
    %cst_41 = arith.constant 1.600000e+01 : f32
    %100 = vector.broadcast %cst_41 : f32 to vector<1x32xf32>
    %101 = arith.divf %99, %100 : vector<1x32xf32>
    %c0_42 = arith.constant 0 : index
    %c0_43 = arith.constant 0 : index
    %c0_44 = arith.constant 0 : index
    %102 = vector.load %arg10[%c0_42, %c0_43, %c0_44] : memref<2x1x32xf32, #tpu.memory_space<vmem>>, vector<1x1x32xf32>
    %103 = vector.shape_cast %102 : vector<1x1x32xf32> to vector<1x32xf32>
    %cst_45 = arith.constant 9.99999974E-6 : f32
    %104 = vector.broadcast %cst_45 : f32 to vector<1x32xf32>
    %105 = arith.addf %101, %104 : vector<1x32xf32>
    %106 = math.rsqrt %105 : vector<1x32xf32>
    %107 = arith.mulf %103, %106 : vector<1x32xf32>
    %108 = vector.broadcast %107 : vector<1x32xf32> to vector<16x32xf32>
    %109 = arith.mulf %96, %108 : vector<16x32xf32>
    %c0_46 = arith.constant 0 : index
    %c0_47 = arith.constant 0 : index
    %c0_48 = arith.constant 0 : index
    %110 = vector.load %arg11[%c0_46, %c0_47, %c0_48] : memref<2x1x32xf32, #tpu.memory_space<vmem>>, vector<1x1x32xf32>
    %111 = vector.shape_cast %110 : vector<1x1x32xf32> to vector<1x32xf32>
    %112 = vector.broadcast %111 : vector<1x32xf32> to vector<16x32xf32>
    %113 = arith.addf %109, %112 : vector<16x32xf32>
    %c1 = arith.constant 1 : index
    %c0_49 = arith.constant 0 : index
    %c0_50 = arith.constant 0 : index
    %114 = vector.load %arg2[%c1, %c0_49, %c0_50] : memref<2x32x96xf32, #tpu.memory_space<vmem>>, vector<1x32x96xf32>
    %115 = vector.shape_cast %114 : vector<1x32x96xf32> to vector<32x96xf32>
    %116 = arith.truncf %113 : vector<16x32xf32> to vector<16x32xbf16>
    %117 = arith.truncf %115 : vector<32x96xf32> to vector<32x96xbf16>
    %cst_51 = arith.constant dense<0.000000e+00> : vector<16x96xf32>
    %118 = tpu.matmul %116, %117, %cst_51 {dimension_numbers = #tpu.dot_dimension_numbers<[1], [0], [0], [1], [0, 0, 1, 1], [], []>} : vector<16x32xbf16>, vector<32x96xbf16>, vector<16x96xf32> -> vector<16x96xf32>
    %c1_52 = arith.constant 1 : index
    %c0_53 = arith.constant 0 : index
    %c0_54 = arith.constant 0 : index
    %119 = vector.load %arg3[%c1_52, %c0_53, %c0_54] : memref<2x1x96xf32, #tpu.memory_space<vmem>>, vector<1x1x96xf32>
    %120 = vector.shape_cast %119 : vector<1x1x96xf32> to vector<1x96xf32>
    %121 = vector.broadcast %120 : vector<1x96xf32> to vector<16x96xf32>
    %122 = arith.addf %118, %121 : vector<16x96xf32>
    %123 = vector.extract_strided_slice %122 {offsets = [0, 0], sizes = [16, 8], strides = [1, 1]} : vector<16x96xf32> to vector<16x8xf32>
    %124 = vector.shape_cast %123 : vector<16x8xf32> to vector<2x8x8xf32>
    %125 = vector.extract_strided_slice %122 {offsets = [0, 8], sizes = [16, 8], strides = [1, 1]} : vector<16x96xf32> to vector<16x8xf32>
    %126 = vector.shape_cast %125 : vector<16x8xf32> to vector<2x8x8xf32>
    %127 = vector.extract_strided_slice %122 {offsets = [0, 16], sizes = [16, 8], strides = [1, 1]} : vector<16x96xf32> to vector<16x8xf32>
    %128 = vector.shape_cast %127 : vector<16x8xf32> to vector<2x8x8xf32>
    %129 = vector.extract_strided_slice %122 {offsets = [0, 24], sizes = [16, 8], strides = [1, 1]} : vector<16x96xf32> to vector<16x8xf32>
    %130 = vector.shape_cast %129 : vector<16x8xf32> to vector<2x8x8xf32>
    %131 = tpu.concatenate %124, %126, %128, %130 in 0 : vector<2x8x8xf32>, vector<2x8x8xf32>, vector<2x8x8xf32>, vector<2x8x8xf32> -> vector<8x8x8xf32>
    %132 = vector.extract_strided_slice %122 {offsets = [0, 32], sizes = [16, 8], strides = [1, 1]} : vector<16x96xf32> to vector<16x8xf32>
    %133 = vector.shape_cast %132 : vector<16x8xf32> to vector<2x8x8xf32>
    %134 = vector.extract_strided_slice %122 {offsets = [0, 40], sizes = [16, 8], strides = [1, 1]} : vector<16x96xf32> to vector<16x8xf32>
    %135 = vector.shape_cast %134 : vector<16x8xf32> to vector<2x8x8xf32>
    %136 = vector.extract_strided_slice %122 {offsets = [0, 48], sizes = [16, 8], strides = [1, 1]} : vector<16x96xf32> to vector<16x8xf32>
    %137 = vector.shape_cast %136 : vector<16x8xf32> to vector<2x8x8xf32>
    %138 = vector.extract_strided_slice %122 {offsets = [0, 56], sizes = [16, 8], strides = [1, 1]} : vector<16x96xf32> to vector<16x8xf32>
    %139 = vector.shape_cast %138 : vector<16x8xf32> to vector<2x8x8xf32>
    %140 = tpu.concatenate %133, %135, %137, %139 in 0 : vector<2x8x8xf32>, vector<2x8x8xf32>, vector<2x8x8xf32>, vector<2x8x8xf32> -> vector<8x8x8xf32>
    %141 = vector.extract_strided_slice %122 {offsets = [0, 64], sizes = [16, 8], strides = [1, 1]} : vector<16x96xf32> to vector<16x8xf32>
    %142 = vector.shape_cast %141 : vector<16x8xf32> to vector<2x8x8xf32>
    %143 = vector.extract_strided_slice %122 {offsets = [0, 72], sizes = [16, 8], strides = [1, 1]} : vector<16x96xf32> to vector<16x8xf32>
    %144 = vector.shape_cast %143 : vector<16x8xf32> to vector<2x8x8xf32>
    %145 = vector.extract_strided_slice %122 {offsets = [0, 80], sizes = [16, 8], strides = [1, 1]} : vector<16x96xf32> to vector<16x8xf32>
    %146 = vector.shape_cast %145 : vector<16x8xf32> to vector<2x8x8xf32>
    %147 = vector.extract_strided_slice %122 {offsets = [0, 88], sizes = [16, 8], strides = [1, 1]} : vector<16x96xf32> to vector<16x8xf32>
    %148 = vector.shape_cast %147 : vector<16x8xf32> to vector<2x8x8xf32>
    %149 = tpu.concatenate %142, %144, %146, %148 in 0 : vector<2x8x8xf32>, vector<2x8x8xf32>, vector<2x8x8xf32>, vector<2x8x8xf32> -> vector<8x8x8xf32>
    "tpu.trace_start"() <{level = 10 : i32, message = "gqd,gkd->gqk"}> : () -> ()
    %cst_55 = arith.constant dense<0.000000e+00> : vector<8x8x8xf32>
    %150 = tpu.matmul %131, %140, %cst_55 {dimension_numbers = #tpu.dot_dimension_numbers<[2], [2], [1], [1], [0, 0, 0, 1, 1, 1], [0], [0]>} : vector<8x8x8xf32>, vector<8x8x8xf32>, vector<8x8x8xf32> -> vector<8x8x8xf32>
    "tpu.trace_stop"() : () -> ()
    %cst_56 = arith.constant 0.353553385 : f32
    %151 = vector.broadcast %cst_56 : f32 to vector<8x8x8xf32>
    %152 = arith.mulf %150, %151 : vector<8x8x8xf32>
    %cst_57 = arith.constant dense<0xFF800000> : vector<8x8xf32>
    %153 = vector.multi_reduction <maximumf>, %152, %cst_57 [2] : vector<8x8x8xf32> to vector<8x8xf32>
    %154 = vector.shape_cast %153 : vector<8x8xf32> to vector<8x8x1xf32>
    %155 = vector.broadcast %154 : vector<8x8x1xf32> to vector<8x8x8xf32>
    %156 = arith.subf %152, %155 : vector<8x8x8xf32>
    %157 = math.exp %156 : vector<8x8x8xf32>
    %cst_58 = arith.constant dense<0.000000e+00> : vector<8x8xf32>
    %158 = vector.multi_reduction <add>, %157, %cst_58 [2] : vector<8x8x8xf32> to vector<8x8xf32>
    %159 = vector.shape_cast %158 : vector<8x8xf32> to vector<8x8x1xf32>
    %160 = tpu.reciprocal %159 {approx = true} : vector<8x8x1xf32> -> vector<8x8x1xf32>
    %161 = vector.broadcast %160 : vector<8x8x1xf32> to vector<8x8x8xf32>
    %162 = arith.mulf %157, %161 : vector<8x8x8xf32>
    "tpu.trace_start"() <{level = 10 : i32, message = "gqk,gkd->gqd"}> : () -> ()
    %cst_59 = arith.constant dense<0.000000e+00> : vector<8x8x8xf32>
    %163 = tpu.matmul %162, %149, %cst_59 {dimension_numbers = #tpu.dot_dimension_numbers<[2], [1], [1], [2], [0, 0, 0, 1, 1, 2], [0], [0]>} : vector<8x8x8xf32>, vector<8x8x8xf32>, vector<8x8x8xf32> -> vector<8x8x8xf32>
    "tpu.trace_stop"() : () -> ()
    %164 = vector.extract_strided_slice %163 {offsets = [0, 0, 0], sizes = [2, 8, 8], strides = [1, 1, 1]} : vector<8x8x8xf32> to vector<2x8x8xf32>
    %165 = vector.extract_strided_slice %163 {offsets = [2, 0, 0], sizes = [2, 8, 8], strides = [1, 1, 1]} : vector<8x8x8xf32> to vector<2x8x8xf32>
    %166 = vector.extract_strided_slice %163 {offsets = [4, 0, 0], sizes = [2, 8, 8], strides = [1, 1, 1]} : vector<8x8x8xf32> to vector<2x8x8xf32>
    %167 = vector.extract_strided_slice %163 {offsets = [6, 0, 0], sizes = [2, 8, 8], strides = [1, 1, 1]} : vector<8x8x8xf32> to vector<2x8x8xf32>
    %168 = tpu.concatenate %164, %165, %166, %167 in 2 : vector<2x8x8xf32>, vector<2x8x8xf32>, vector<2x8x8xf32>, vector<2x8x8xf32> -> vector<2x8x32xf32>
    %169 = vector.shape_cast %168 : vector<2x8x32xf32> to vector<16x32xf32>
    %c1_60 = arith.constant 1 : index
    %c0_61 = arith.constant 0 : index
    %c0_62 = arith.constant 0 : index
    %170 = vector.load %arg4[%c1_60, %c0_61, %c0_62] : memref<2x32x32xf32, #tpu.memory_space<vmem>>, vector<1x32x32xf32>
    %171 = vector.shape_cast %170 : vector<1x32x32xf32> to vector<32x32xf32>
    %172 = arith.truncf %169 : vector<16x32xf32> to vector<16x32xbf16>
    %173 = arith.truncf %171 : vector<32x32xf32> to vector<32x32xbf16>
    %cst_63 = arith.constant dense<0.000000e+00> : vector<16x32xf32>
    %174 = tpu.matmul %172, %173, %cst_63 {dimension_numbers = #tpu.dot_dimension_numbers<[1], [0], [0], [1], [0, 0, 1, 1], [], []>} : vector<16x32xbf16>, vector<32x32xbf16>, vector<16x32xf32> -> vector<16x32xf32>
    %c1_64 = arith.constant 1 : index
    %c0_65 = arith.constant 0 : index
    %c0_66 = arith.constant 0 : index
    %175 = vector.load %arg5[%c1_64, %c0_65, %c0_66] : memref<2x1x32xf32, #tpu.memory_space<vmem>>, vector<1x1x32xf32>
    %176 = vector.shape_cast %175 : vector<1x1x32xf32> to vector<1x32xf32>
    %177 = vector.broadcast %176 : vector<1x32xf32> to vector<16x32xf32>
    %178 = arith.addf %174, %177 : vector<16x32xf32>
    %179 = arith.addf %113, %178 : vector<16x32xf32>
    %c1_67 = arith.constant 1 : index
    %c0_68 = arith.constant 0 : index
    %c0_69 = arith.constant 0 : index
    %180 = vector.load %arg6[%c1_67, %c0_68, %c0_69] : memref<2x32x32xf32, #tpu.memory_space<vmem>>, vector<1x32x32xf32>
    %181 = vector.shape_cast %180 : vector<1x32x32xf32> to vector<32x32xf32>
    %182 = arith.truncf %179 : vector<16x32xf32> to vector<16x32xbf16>
    %183 = arith.truncf %181 : vector<32x32xf32> to vector<32x32xbf16>
    %cst_70 = arith.constant dense<0.000000e+00> : vector<16x32xf32>
    %184 = tpu.matmul %182, %183, %cst_70 {dimension_numbers = #tpu.dot_dimension_numbers<[1], [0], [0], [1], [0, 0, 1, 1], [], []>} : vector<16x32xbf16>, vector<32x32xbf16>, vector<16x32xf32> -> vector<16x32xf32>
    %c1_71 = arith.constant 1 : index
    %c0_72 = arith.constant 0 : index
    %c0_73 = arith.constant 0 : index
    %185 = vector.load %arg7[%c1_71, %c0_72, %c0_73] : memref<2x1x32xf32, #tpu.memory_space<vmem>>, vector<1x1x32xf32>
    %186 = vector.shape_cast %185 : vector<1x1x32xf32> to vector<1x32xf32>
    %187 = vector.broadcast %186 : vector<1x32xf32> to vector<16x32xf32>
    %188 = arith.addf %184, %187 : vector<16x32xf32>
    %cst_74 = arith.constant 0.000000e+00 : f32
    %189 = vector.broadcast %cst_74 : f32 to vector<16x32xf32>
    %190 = arith.maximumf %188, %189 : vector<16x32xf32>
    %c1_75 = arith.constant 1 : index
    %c0_76 = arith.constant 0 : index
    %c0_77 = arith.constant 0 : index
    %191 = vector.load %arg8[%c1_75, %c0_76, %c0_77] : memref<2x32x32xf32, #tpu.memory_space<vmem>>, vector<1x32x32xf32>
    %192 = vector.shape_cast %191 : vector<1x32x32xf32> to vector<32x32xf32>
    %193 = arith.truncf %190 : vector<16x32xf32> to vector<16x32xbf16>
    %194 = arith.truncf %192 : vector<32x32xf32> to vector<32x32xbf16>
    %cst_78 = arith.constant dense<0.000000e+00> : vector<16x32xf32>
    %195 = tpu.matmul %193, %194, %cst_78 {dimension_numbers = #tpu.dot_dimension_numbers<[1], [0], [0], [1], [0, 0, 1, 1], [], []>} : vector<16x32xbf16>, vector<32x32xbf16>, vector<16x32xf32> -> vector<16x32xf32>
    %c1_79 = arith.constant 1 : index
    %c0_80 = arith.constant 0 : index
    %c0_81 = arith.constant 0 : index
    %196 = vector.load %arg9[%c1_79, %c0_80, %c0_81] : memref<2x1x32xf32, #tpu.memory_space<vmem>>, vector<1x1x32xf32>
    %197 = vector.shape_cast %196 : vector<1x1x32xf32> to vector<1x32xf32>
    %198 = vector.broadcast %197 : vector<1x32xf32> to vector<16x32xf32>
    %199 = arith.addf %195, %198 : vector<16x32xf32>
    %200 = arith.addf %179, %199 : vector<16x32xf32>
    %cst_82 = arith.constant dense<0.000000e+00> : vector<32xf32>
    %201 = vector.multi_reduction <add>, %200, %cst_82 [0] : vector<16x32xf32> to vector<32xf32>
    %202 = vector.shape_cast %201 : vector<32xf32> to vector<1x32xf32>
    %cst_83 = arith.constant 1.600000e+01 : f32
    %203 = vector.broadcast %cst_83 : f32 to vector<1x32xf32>
    %204 = arith.divf %202, %203 : vector<1x32xf32>
    %205 = vector.broadcast %204 : vector<1x32xf32> to vector<16x32xf32>
    %206 = arith.subf %200, %205 : vector<16x32xf32>
    %207 = arith.mulf %206, %206 : vector<16x32xf32>
    %cst_84 = arith.constant dense<0.000000e+00> : vector<32xf32>
    %208 = vector.multi_reduction <add>, %207, %cst_84 [0] : vector<16x32xf32> to vector<32xf32>
    %209 = vector.shape_cast %208 : vector<32xf32> to vector<1x32xf32>
    %cst_85 = arith.constant 1.600000e+01 : f32
    %210 = vector.broadcast %cst_85 : f32 to vector<1x32xf32>
    %211 = arith.divf %209, %210 : vector<1x32xf32>
    %c1_86 = arith.constant 1 : index
    %c0_87 = arith.constant 0 : index
    %c0_88 = arith.constant 0 : index
    %212 = vector.load %arg10[%c1_86, %c0_87, %c0_88] : memref<2x1x32xf32, #tpu.memory_space<vmem>>, vector<1x1x32xf32>
    %213 = vector.shape_cast %212 : vector<1x1x32xf32> to vector<1x32xf32>
    %cst_89 = arith.constant 9.99999974E-6 : f32
    %214 = vector.broadcast %cst_89 : f32 to vector<1x32xf32>
    %215 = arith.addf %211, %214 : vector<1x32xf32>
    %216 = math.rsqrt %215 : vector<1x32xf32>
    %217 = arith.mulf %213, %216 : vector<1x32xf32>
    %218 = vector.broadcast %217 : vector<1x32xf32> to vector<16x32xf32>
    %219 = arith.mulf %206, %218 : vector<16x32xf32>
    %c1_90 = arith.constant 1 : index
    %c0_91 = arith.constant 0 : index
    %c0_92 = arith.constant 0 : index
    %220 = vector.load %arg11[%c1_90, %c0_91, %c0_92] : memref<2x1x32xf32, #tpu.memory_space<vmem>>, vector<1x1x32xf32>
    %221 = vector.shape_cast %220 : vector<1x1x32xf32> to vector<1x32xf32>
    %222 = vector.broadcast %221 : vector<1x32xf32> to vector<16x32xf32>
    %223 = arith.addf %219, %222 : vector<16x32xf32>
    %c0_93 = arith.constant 0 : index
    %c0_94 = arith.constant 0 : index
    %224 = vector.load %arg22[%c0_93, %c0_94] : memref<16x32xf32, #tpu.memory_space<vmem>>, vector<16x32xf32>
    tpu.vector_store %arg22[%c0_93, %c0_94], %223 {strides = array<i32>} : memref<16x32xf32, #tpu.memory_space<vmem>>, vector<16x32xf32>,
    %c0_95 = arith.constant 0 : index
    %c0_96 = arith.constant 0 : index
    %225 = vector.load %arg12[%c0_95, %c0_96] : memref<32x32xf32, #tpu.memory_space<vmem>>, vector<32x32xf32>
    %cst_97 = arith.constant dense<0.000000e+00> : vector<16x32xf32>
    %226 = tpu.matmul %223, %225, %cst_97 {dimension_numbers = #tpu.dot_dimension_numbers<[1], [0], [0], [1], [0, 0, 1, 1], [], []>} : vector<16x32xf32>, vector<32x32xf32>, vector<16x32xf32> -> vector<16x32xf32>
    %c0_98 = arith.constant 0 : index
    %c0_99 = arith.constant 0 : index
    %227 = vector.load %arg13[%c0_98, %c0_99] : memref<1x32xf32, #tpu.memory_space<vmem>>, vector<1x32xf32>
    %228 = vector.broadcast %227 : vector<1x32xf32> to vector<16x32xf32>
    %229 = arith.addf %226, %228 : vector<16x32xf32>
    %230 = vector.shape_cast %229 : vector<16x32xf32> to vector<2x8x32xf32>
    %cst_100 = arith.constant dense<0.000000e+00> : vector<2x32xf32>
    %231 = vector.multi_reduction <add>, %230, %cst_100 [1] : vector<2x8x32xf32> to vector<2x32xf32>
    %c0_101 = arith.constant 0 : index
    %c0_102 = arith.constant 0 : index
    %232 = vector.load %arg24[%c0_101, %c0_102] : memref<2x32xf32, #tpu.memory_space<vmem>>, vector<2x32xf32>
    tpu.vector_store %arg24[%c0_101, %c0_102], %231 {strides = array<i32>} : memref<2x32xf32, #tpu.memory_space<vmem>>, vector<2x32xf32>,
    %233 = math.tanh %231 : vector<2x32xf32>
    %c0_103 = arith.constant 0 : index
    %c0_104 = arith.constant 0 : index
    %234 = vector.load %arg15[%c0_103, %c0_104] : memref<32x32xf32, #tpu.memory_space<vmem>>, vector<32x32xf32>
    %cst_105 = arith.constant dense<0.000000e+00> : vector<2x32xf32>
    %235 = tpu.matmul %233, %234, %cst_105 {dimension_numbers = #tpu.dot_dimension_numbers<[1], [0], [0], [1], [0, 0, 1, 1], [], []>} : vector<2x32xf32>, vector<32x32xf32>, vector<2x32xf32> -> vector<2x32xf32>
    %c0_106 = arith.constant 0 : index
    %c0_107 = arith.constant 0 : index
    %236 = vector.load %arg16[%c0_106, %c0_107] : memref<1x32xf32, #tpu.memory_space<vmem>>, vector<1x32xf32>
    %237 = vector.broadcast %236 : vector<1x32xf32> to vector<2x32xf32>
    %238 = arith.addf %235, %237 : vector<2x32xf32>
    %c0_108 = arith.constant 0 : index
    %c0_109 = arith.constant 0 : index
    %239 = vector.load %arg17[%c0_108, %c0_109] : memref<1x32xf32, #tpu.memory_space<vmem>>, vector<1x32xf32>
    %c0_110 = arith.constant 0 : index
    %c0_111 = arith.constant 0 : index
    %240 = vector.load %arg18[%c0_110, %c0_111] : memref<32x32xf32, #tpu.memory_space<vmem>>, vector<32x32xf32>
    %cst_112 = arith.constant dense<0.000000e+00> : vector<1x32xf32>
    %241 = tpu.matmul %239, %240, %cst_112 {dimension_numbers = #tpu.dot_dimension_numbers<[1], [0], [0], [1], [0, 0, 1, 1], [], []>} : vector<1x32xf32>, vector<32x32xf32>, vector<1x32xf32> -> vector<1x32xf32>
    %c0_113 = arith.constant 0 : index
    %c0_114 = arith.constant 0 : index
    %242 = vector.load %arg19[%c0_113, %c0_114] : memref<1x32xf32, #tpu.memory_space<vmem>>, vector<1x32xf32>
    %243 = arith.addf %241, %242 : vector<1x32xf32>
    %c0_115 = arith.constant 0 : index
    %c0_116 = arith.constant 0 : index
    %244 = vector.load %arg14[%c0_115, %c0_116] : memref<1x32xf32, #tpu.memory_space<vmem>>, vector<1x32xf32>
    %245 = vector.broadcast %244 : vector<1x32xf32> to vector<2x32xf32>
    %246 = arith.addf %238, %245 : vector<2x32xf32>
    %247 = vector.broadcast %243 : vector<1x32xf32> to vector<2x32xf32>
    %248 = arith.addf %246, %247 : vector<2x32xf32>
    %c0_117 = arith.constant 0 : index
    %c0_118 = arith.constant 0 : index
    %249 = vector.load %arg20[%c0_117, %c0_118] : memref<32x32xf32, #tpu.memory_space<vmem>>, vector<32x32xf32>
    %cst_119 = arith.constant dense<0.000000e+00> : vector<2x32xf32>
    %250 = tpu.matmul %248, %249, %cst_119 {dimension_numbers = #tpu.dot_dimension_numbers<[1], [0], [0], [1], [0, 0, 1, 1], [], []>} : vector<2x32xf32>, vector<32x32xf32>, vector<2x32xf32> -> vector<2x32xf32>
    %c0_120 = arith.constant 0 : index
    %c0_121 = arith.constant 0 : index
    %251 = vector.load %arg21[%c0_120, %c0_121] : memref<1x32xf32, #tpu.memory_space<vmem>>, vector<1x32xf32>
    %252 = vector.broadcast %251 : vector<1x32xf32> to vector<2x32xf32>
    %253 = arith.addf %250, %252 : vector<2x32xf32>
    %c0_122 = arith.constant 0 : index
    %c0_123 = arith.constant 0 : index
    %254 = vector.load %arg23[%c0_122, %c0_123] : memref<2x32xf32, #tpu.memory_space<vmem>>, vector<2x32xf32>
    tpu.vector_store %arg23[%c0_122, %c0_123], %253 {strides = array<i32>} : memref<2x32xf32, #tpu.memory_space<vmem>>, vector<2x32xf32>,
    return
  }
}

</mosaic_0001>

<bundles_post_ra>
// kernel: tpu_custom_call.1
= control target key start
LH: loop header
LB: loop body
LE: loop exit
PB: predicated region body
PF: predicated region fallthrough
CT: control target
= control target key end

     0   :  { %s5632_s0 = inlined_call_operand.vmem [shape: f32[2,8,2], index: 0, kind: input, shape index: {}]   ;;  %s5633_s1 = inlined_call_operand.vmem [shape: f32[2,32], index: 1, kind: input, shape index: {}]   ;;  %s5634_s2 = inlined_call_operand.hbm [shape: f32[2,32,96], index: 2, kind: input, shape index: {}]   ;;  %s5635_s3 = inlined_call_operand.vmem [shape: f32[2,1,96], index: 3, kind: input, shape index: {}]   ;;  %s5636_s4 = inlined_call_operand.hbm [shape: f32[2,32,32], index: 4, kind: input, shape index: {}]   ;;  %s5637_s5 = inlined_call_operand.vmem [shape: f32[2,1,32], index: 5, kind: input, shape index: {}]   ;;  %s5638_s6 = inlined_call_operand.hbm [shape: f32[2,32,32], index: 6, kind: input, shape index: {}]   ;;  %s5639_s7 = inlined_call_operand.vmem [shape: f32[2,1,32], index: 7, kind: input, shape index: {}]   ;;  %s5640_s8 = inlined_call_operand.hbm [shape: f32[2,32,32], index: 8, kind: input, shape index: {}]   ;;  %s5641_s9 = inlined_call_operand.hbm [shape: f32[2,1,32], index: 9, kind: input, shape index: {}]   ;;  %s5642_s10 = inlined_call_operand.hbm [shape: f32[2,1,32], index: 10, kind: input, shape index: {}]   ;;  %s5643_s11 = inlined_call_operand.hbm [shape: f32[2,1,32], index: 11, kind: input, shape index: {}]   ;;  %s5644_s12 = inlined_call_operand.vmem [shape: f32[32,32], index: 12, kind: input, shape index: {}]   ;;  %s5645_s13 = inlined_call_operand.vmem [shape: f32[1,32], index: 13, kind: input, shape index: {}]   ;;  %s5646_s14 = inlined_call_operand.vmem [shape: f32[1,32], index: 14, kind: input, shape index: {}]   ;;  %s5647_s15 = inlined_call_operand.hbm [shape: f32[32,32], index: 15, kind: input, shape index: {}]   ;;  %s5648_s16 = inlined_call_operand.vmem [shape: f32[1,32], index: 16, kind: input, shape index: {}]   ;;  %s5649_s17 = inlined_call_operand.vmem [shape: f32[1,32], index: 17, kind: input, shape index: {}]   ;;  %s5650_s18 = inlined_call_operand.hbm [shape: f32[32,32], index: 18, kind: input, shape index: {}]   ;;  %s5651_s19 = inlined_call_operand.vmem [shape: f32[1,32], index: 19, kind: input, shape index: {}]   ;;  %s5652_s20 = inlined_call_operand.hbm [shape: f32[32,32], index: 20, kind: input, shape index: {}]   ;;  %s5653_s21 = inlined_call_operand.vmem [shape: f32[1,32], index: 21, kind: input, shape index: {}]   ;;  %s5654_s22 = inlined_call_operand.hbm [shape: f32[16,32], index: 22, kind: output, shape index: {0}]   ;;  %s5655_s23 = inlined_call_operand.hbm [shape: f32[2,32], index: 23, kind: output, shape index: {1}]   ;;  %s5656_s24 = inlined_call_operand.hbm [shape: f32[2,32], index: 24, kind: output, shape index: {2}]  }
   0x1   :  { %5661 = sst [smem:[#allocation31_spill]] %s5632_s0 }
   0x2   :  { %5662 = sst [smem:[#allocation32_spill]] %s5633_s1 }
   0x3   :  { %5663 = sst [smem:[#allocation33_spill]] %s5634_s2 }
   0x4   :  { %5664 = sst [smem:[#allocation34_spill]] %s5635_s3 }
   0x5   :  { %5665 = sst [smem:[#allocation35_spill]] %s5636_s4 }
   0x6   :  { %5666 = sst [smem:[#allocation36_spill]] %s5637_s5 }
   0x7   :  { %5667 = sst [smem:[#allocation37_spill]] %s5638_s6 }
   0x8   :  { %5668 = sst [smem:[#allocation38_spill]] %s5639_s7 }
   0x9   :  { %5669 = sst [smem:[#allocation39_spill]] %s5640_s8 }
   0xa   :  { %30 = vsyncpa [#allocation3], 0 }
   0xb   :  { %31 = vsyncpa [#allocation6], 0 }
   0xc   :  { %32 = vsyncpa [#allocation9], 0 }
   0xd   :  { %33 = vsyncpa [#allocation12], 0 }
   0xe   :  { %34 = vsyncpa [#allocation15], 0 }
   0xf   :  { %35 = vsyncpa [#allocation18], 0 }
  0x10   :  { %36 = vsyncpa [#allocation4], 0 }
  0x11   :  { %37 = vsyncpa [#allocation21], 0  ;;  %s4893_s5 = smov [#allocation5]   ;;  %s4894_s27 = smov [#allocation8]  }
  0x12   :  { %s61_s26 = sshll.u32 %s4893_s5, 4  ;;  %s89_s28 = sshll.u32 %s4894_s27, 4  ;;  %s62_s26 = int_to_ptr.vmem [resolvable:$true] %s61_s26  ;;  %s90_s28 = int_to_ptr.vmem [resolvable:$true] %s89_s28 }
  0x13   :  { %s4625_s6 = scalar_lea.vmem %s62_s26, 1024  ;;  %p4630_p1 = scmp.lt.s32.totalorder %s62_s26, %s62_s26 }
  0x14   :  { %p4626_p0 = scmp.ne.s32.totalorder %s62_s26, %s4625_s6  ;;  %p4631_p2 = scmp.lt.s32.totalorder %s4625_s6, %s4625_s6 }
  0x16   :  { %p4632_p3 = por %p4631_p2, %p4630_p1 }
  0x18   :  { %p4633_p4 = pnand %p4632_p3, %p4626_p0 }
  0x1a   :  { %4636 = shalt.err (!%p4633_p4)
}
  0x1b   :  { %s4895_s2 = smov 128   ;;  %s4896_s29 = smov 8  }
  0x1c   :  { %s5670_s30 = sld [smem:[#allocation35_spill]]  ;;  %s4645_s3 = scalar_lea.vmem %s90_s28, 1024 }
  0x1d   :  { %p4646_p5 = scmp.ne.s32.totalorder %s90_s28, %s4645_s3  ;;  %p4650_p6 = scmp.lt.s32.totalorder %s90_s28, %s90_s28 }
  0x1e   :  { %p4651_p7 = scmp.lt.s32.totalorder %s4645_s3, %s4645_s3 }
  0x20   :  { %p4652_p8 = por %p4651_p7, %p4650_p6 }
  0x22   :  { %67 = dma.hbm_to_vmem [thread:$0]  %s5670_s30, 1024, %s62_s26, [#allocation6], %s4895_s2, %s4895_s2, %s4896_s29  }
  0x23   :  { %p4653_p9 = pnand %p4652_p8, %p4646_p5 }
  0x25   :  { %4656 = shalt.err (!%p4653_p9)
}
  0x26   :  { %s5671_s4 = sld [smem:[#allocation39_spill]]  ;;  %s4897_s1 = smov [#allocation11]  }
  0x27   :  { %s113_s5 = sshll.u32 %s4897_s1, 4  ;;  %s4898_s27 = smov [#allocation14]   ;;  %s114_s5 = int_to_ptr.vmem [resolvable:$true] %s113_s5 }
  0x28   :  { %s143_s6 = sshll.u32 %s4898_s27, 4  ;;  %s4665_s26 = scalar_lea.vmem %s114_s5, 32  ;;  %s144_s6 = int_to_ptr.vmem [resolvable:$true] %s143_s6 }
  0x29   :  { %p4666_p10 = scmp.ne.s32.totalorder %s114_s5, %s4665_s26  ;;  %p4670_p11 = scmp.lt.s32.totalorder %s114_s5, %s114_s5 }
  0x2a   :  { %p4671_p12 = scmp.lt.s32.totalorder %s4665_s26, %s4665_s26 }
  0x2c   :  { %95 = dma.hbm_to_vmem [thread:$0]  %s5671_s4, 1024, %s90_s28, [#allocation9], %s4895_s2, %s4895_s2, %s4896_s29  }
  0x2d   :  { %p4672_p13 = por %p4671_p12, %p4670_p11 }
  0x2f   :  { %p4673_p0 = pnand %p4672_p13, %p4666_p10 }
  0x31   :  { %4676 = shalt.err (!%p4673_p0)
}
  0x32   :  { %s4899_s0 = smov 16   ;;  %s4900_s7 = smov 1  }
  0x33   :  { %119 = dma.hbm_to_vmem [thread:$0]  %s5642_s10, 32, %s114_s5, [#allocation12], %s4899_s0, %s4899_s0, %s4900_s7  }
  0x34   :  { %s4685_s3 = scalar_lea.vmem %s144_s6, 512  ;;  %p4690_p2 = scmp.lt.s32.totalorder %s144_s6, %s144_s6 }
  0x35   :  { %p4686_p1 = scmp.ne.s32.totalorder %s144_s6, %s4685_s3  ;;  %p4691_p3 = scmp.lt.s32.totalorder %s4685_s3, %s4685_s3 }
  0x37   :  { %p4692_p4 = por %p4691_p3, %p4690_p2 }
  0x39   :  { %p4693_p5 = pnand %p4692_p4, %p4686_p1 }
  0x3b   :  { %4696 = shalt.err (!%p4693_p5)
}
  0x3c   :  { %149 = dma.hbm_to_vmem [thread:$0]  %s5647_s15, 512, %s144_s6, [#allocation15], %s4895_s2, %s4895_s2, %s4896_s29  }
  0x3d   :  { %s4901_s4 = smov [#allocation2]   ;;  %s4902_s27 = smov [#allocation7]  }
  0x3e   :  { %s47_s1 = sshll.u32 %s4901_s4, 4  ;;  %s75_s26 = sshll.u32 %s4902_s27, 4  ;;  %s48_s1 = int_to_ptr.vmem [resolvable:$true] %s47_s1  ;;  %s76_s26 = int_to_ptr.vmem [resolvable:$true] %s75_s26 }
  0x3f   :  { %s4705_s10 = scalar_lea.vmem %s48_s1, 1024  ;;  %p4710_p7 = scmp.lt.s32.totalorder %s48_s1, %s48_s1 }
  0x40   :  { %p4706_p6 = scmp.ne.s32.totalorder %s48_s1, %s4705_s10  ;;  %p4711_p8 = scmp.lt.s32.totalorder %s4705_s10, %s4705_s10 }
  0x42   :  { %p4712_p9 = por %p4711_p8, %p4710_p7 }
  0x44   :  { %p4713_p10 = pnand %p4712_p9, %p4706_p6 }
  0x46   :  { %4716 = shalt.err (!%p4713_p10)
}
  0x47   :  { %s5672_s28 = sld [smem:[#allocation33_spill]]  ;;  %s4725_s15 = scalar_lea.vmem %s76_s26, 1024 }
  0x48   :  { %p4726_p11 = scmp.ne.s32.totalorder %s76_s26, %s4725_s15  ;;  %p4730_p12 = scmp.lt.s32.totalorder %s76_s26, %s76_s26 }
  0x49   :  { %p4731_p13 = scmp.lt.s32.totalorder %s4725_s15, %s4725_s15 }
  0x4b   :  { %p4732_p0 = por %p4731_p13, %p4730_p12 }
  0x4d   :  { %53 = dma.hbm_to_vmem [thread:$0]  %s5672_s28, 1024, %s48_s1, [#allocation3], %s4895_s2, %s4895_s2, %s4896_s29  }
  0x4e   :  { %p4733_p1 = pnand %p4732_p0, %p4726_p11 }
  0x50   :  { %4736 = shalt.err (!%p4733_p1)
}
  0x51   :  { %s5673_s25 = sld [smem:[#allocation37_spill]]  ;;  %s4903_s8 = smov [#allocation10]  }
  0x52   :  { %s101_s4 = sshll.u32 %s4903_s8, 4  ;;  %s4904_s27 = smov [#allocation13]   ;;  %s102_s4 = int_to_ptr.vmem [resolvable:$true] %s101_s4 }
  0x53   :  { %s125_s10 = sshll.u32 %s4904_s27, 4  ;;  %s4745_s1 = scalar_lea.vmem %s102_s4, 32  ;;  %s126_s10 = int_to_ptr.vmem [resolvable:$true] %s125_s10 }
  0x54   :  { %p4746_p2 = scmp.ne.s32.totalorder %s102_s4, %s4745_s1  ;;  %p4750_p3 = scmp.lt.s32.totalorder %s102_s4, %s102_s4 }
  0x55   :  { %p4751_p4 = scmp.lt.s32.totalorder %s4745_s1, %s4745_s1 }
  0x57   :  { %81 = dma.hbm_to_vmem [thread:$0]  %s5673_s25, 1024, %s76_s26, [#allocation6], %s4895_s2, %s4895_s2, %s4896_s29  }
  0x58   :  { %p4752_p5 = por %p4751_p4, %p4750_p3 }
  0x5a   :  { %p4753_p6 = pnand %p4752_p5, %p4746_p2 }
  0x5c   :  { %4756 = shalt.err (!%p4753_p6)
}
  0x5d   :  { %107 = dma.hbm_to_vmem [thread:$0]  %s5641_s9, 32, %s102_s4, [#allocation9], %s4899_s0, %s4899_s0, %s4900_s7  }
  0x5e   :  { %s4765_s26 = scalar_lea.vmem %s126_s10, 32  ;;  %p4770_p8 = scmp.lt.s32.totalorder %s126_s10, %s126_s10 }
  0x5f   :  { %p4766_p7 = scmp.ne.s32.totalorder %s126_s10, %s4765_s26  ;;  %p4771_p9 = scmp.lt.s32.totalorder %s4765_s26, %s4765_s26 }
  0x61   :  { %p4772_p10 = por %p4771_p9, %p4770_p8 }
  0x63   :  { %p4773_p11 = pnand %p4772_p10, %p4766_p7 }
  0x65   :  { %4776 = shalt.err (!%p4773_p11)
}
  0x66   :  { %131 = dma.hbm_to_vmem [thread:$0]  %s5643_s11, 32, %s126_s10, [#allocation12], %s4899_s0, %s4899_s0, %s4900_s7  }
  0x67   :  { %s4905_s6 = smov [#allocation16]   ;;  %s4906_s25 = smov [#allocation17]  }
  0x68   :  { %s159_s3 = sshll.u32 %s4905_s6, 4  ;;  %s173_s8 = sshll.u32 %s4906_s25, 4  ;;  %s160_s3 = int_to_ptr.vmem [resolvable:$true] %s159_s3  ;;  %s174_s8 = int_to_ptr.vmem [resolvable:$true] %s173_s8 }
  0x69   :  { %s4785_s9 = scalar_lea.vmem %s160_s3, 512  ;;  %p4790_p13 = scmp.lt.s32.totalorder %s160_s3, %s160_s3 }
  0x6a   :  { %p4786_p12 = scmp.ne.s32.totalorder %s160_s3, %s4785_s9  ;;  %p4791_p0 = scmp.lt.s32.totalorder %s4785_s9, %s4785_s9 }
  0x6c   :  { %p4792_p1 = por %p4791_p0, %p4790_p13 }
  0x6e   :  { %p4793_p2 = pnand %p4792_p1, %p4786_p12 }
  0x70   :  { %4796 = shalt.err (!%p4793_p2)
}
  0x71   :  { %165 = dma.hbm_to_vmem [thread:$0]  %s5650_s18, 512, %s160_s3, [#allocation15], %s4895_s2, %s4895_s2, %s4896_s29  }
  0x72   :  { %s4805_s11 = scalar_lea.vmem %s174_s8, 512  ;;  %p4810_p4 = scmp.lt.s32.totalorder %s174_s8, %s174_s8 }
  0x73   :  { %p4806_p3 = scmp.ne.s32.totalorder %s174_s8, %s4805_s11  ;;  %p4811_p5 = scmp.lt.s32.totalorder %s4805_s11, %s4805_s11 }
  0x75   :  { %p4812_p6 = por %p4811_p5, %p4810_p4 }
  0x77   :  { %p4813_p7 = pnand %p4812_p6, %p4806_p3 }
  0x79   :  { %4816 = shalt.err (!%p4813_p7)
}
  0x7a   :  { %179 = dma.hbm_to_vmem [thread:$0]  %s5652_s20, 512, %s174_s8, [#allocation18], %s4895_s2, %s4895_s2, %s4896_s29  }
  0x7b   :  { %4877 = dma.done.wait [#allocation3], 1024  }
  0x7c   :  { %4878 = vsyncadd [#allocation3], 4294966272 }
  0x7d   :  { %4879 = dma.done.wait [#allocation6], 2048  }
  0x7e   :  { %4880 = vsyncadd [#allocation6], 4294965248 }
  0x7f   :  { %4881 = dma.done.wait [#allocation9], 1056  }
  0x80   :  { %4882 = vsyncadd [#allocation9], 4294966240 }
  0x81   :  { %4883 = dma.done.wait [#allocation12], 64  }
  0x82   :  { %4884 = vsyncadd [#allocation12], 4294967232 }
  0x83   :  { %4885 = dma.done.wait [#allocation15], 1024  }
  0x84   :  { %4886 = vsyncadd [#allocation15], 4294966272 }
  0x85   :  { %4887 = dma.done.wait [#allocation18], 512  }
  0x86   :  { %4888 = vsyncadd [#allocation18], 4294966784  ;;  %v4907_v0 = vmov 0.0   ;;  %vm223_vm0 = vcmask 1041408   ;;  %vm216_vm1 = vcmask 15360   ;;  %s5674_s20 = sld [smem:[#allocation32_spill]] }
  0x87   :  { %4230 = vmatprep.subr.mxu0 %v4907_v0  ;;  %s5675_s26 = sld [smem:[#allocation31_spill]]  ;;  %v304_v4 = vld [vmem:[#allocation2 + $0x10] sm:$0xff]  ;;  %v305_v5 = vld [vmem:[#allocation2 + $0x18] sm:$0xff]  ;;  %v302_v7 = vld [vmem:[#allocation2] sm:$0xff]  ;;  %vm4908_vm2 = vmmov 0   ;;  %vm316_vm3 = vcmask 261120  }
  0x88   :  { %v308_v6 = vpack.c.bf16 %v305_v5, %v304_v4  ;;  %v303_v8 = vld [vmem:[#allocation2 + $0x8] sm:$0xff]  ;;  %4232 = vmatprep.mubr.msk.f32.mxu0 %vm4908_vm2, %v4907_v0  ;;  %s5676_s25 = sld [smem:[#allocation34_spill]]  ;;  %s4909_s8 = smov 112   ;;  %vm377_vm4 = vcmask 64512   ;;  %vm1714_vm5 = vcmask 130048   ;;  %vm1717_vm6 = vcmask 195584  }
  0x89   :  { %v307_v9 = vpack.c.bf16 %v303_v8, %v302_v7  ;;  %s4910_s9 = smov 120   ;;  %s4911_s4 = smov 104   ;;  %vm3705_vm7 = vcmask 1041409   ;;  %vm3708_vm8 = vcmask 254976  }
  0x8a   :  { %s4912_s27 = smov 96   ;;  %s4913_s11 = smov 64  }
  0x8b   :  { %s4914_s7 = smov 24   ;;  %s5677_s1 = sld [smem:[#allocation36_spill]] }
  0x8c   :  { %v215_v1 = vld [vmem:[%s5674_s20] sm:$0x3]  ;;  %s5678_s30 = sld [smem:[#allocation38_spill]] }
  0x8d   :  { %v213_v2 = vld [vmem:[%s5675_s26] sm:$0xff]  ;;  %v214_v3 = vld [vmem:[%s5675_s26 + $0x8] sm:$0xff]  ;;  %4217 = vmatprep.subr.msk.mxu1 %vm223_vm0, %v215_v1 }
  0x8e   :  { %4219 = vmatprep.mubr.msk.f32.mxu1 %vm216_vm1, %v213_v2  ;;  %4218 = vmatpush3.msk.msra.mxu1 %vm223_vm0, %v215_v1  ;;  %v4027_v13 = vld [vmem:[%s5676_s25] ss:$0 sm:$0xff] }
  0x8f   :  { %4220 = vmatmul.mubr.msk.f32.vlgmr.msra.gmra.mxu1 %vm216_vm1, %v214_v3  ;;  %4222 = vmatprep.subr.bf16.mxu1 %v4907_v0 }
  0x90   :  { %4223 = vmatpush3.bf16.msra.mxu1 %v308_v6  ;;  %4226 = vmatprep.mubr.msk.bf16.mxu1 %vm4908_vm2, %v4907_v0 }
  0x91   :  { %4224 = vmatprep.subr.bf16.mxu1 %v4907_v0 }
  0x94   :  { %4225 = vmatpush3.bf16.msra.mxu1 %v307_v9 }
  0x95   :  { %4245 = vmatprep.subr.mxu1 %v4907_v0 }
 0x14f   :  { %v5120_v10 = vpop.f32.mrf.mxu1 }
 0x151   :  { %v5122_v11 = vpop.f32.mrf.mxu1 }
 0x152   :  { %v306_v12 = vpack.c.bf16 %v5120_v10, %v5122_v11 }
 0x154   :  { %4227 = vmatmul.mubr.msk.bf16.vlgmr.msra.gmra.mxu1 %vm316_vm3, %v306_v12 }
 0x155   :  { %4247 = vmatprep.mubr.msk.f32.mxu1 %vm4908_vm2, %v4907_v0 }
 0x214   :  { %v354_v14 = vpop.f32.mrf.mxu1 }
 0x215   :  { %v5132_v15 = vadd.f32 %v4027_v13, %v354_v14 }
 0x216   :  { %v4228_v16 = vpop.f32.mrf.mxu1 }
 0x217   :  { %367 = vrot.lane.b32.xlu1 %v5132_v15, %s4909_s8  ;;  %363 = vrot.lane.b32.xlu0 %v5132_v15, %s4910_s9 }
 0x218   :  { %v357_v17 = vpop.f32.mrf.mxu1 }
 0x219   :  { %v5138_v18 = vadd.f32 %v4027_v13, %v357_v17 }
 0x21a   :  { %v4229_v19 = vpop.f32.mrf.mxu1 }
 0x21b   :  { %369 = vrot.lane.b32.xlu1 %v5138_v18, %s4909_s8  ;;  %365 = vrot.lane.b32.xlu0 %v5138_v18, %s4910_s9 }
 0x21f   :  { %373 = vrot.lane.b32.xlu1 %v5138_v18, %s4911_s4  ;;  %371 = vrot.lane.b32.xlu0 %v5132_v15, %s4911_s4 }
 0x223   :  { %452 = vrot.lane.b32.xlu1 %v5138_v18, %s4912_s27  ;;  %375 = vrot.lane.b32.xlu0 %v5132_v15, %s4912_s27 }
 0x289   :  { %v5152_v20 = vpop.permute.xlu1 %367  ;;  %v5154_v21 = vpop.permute.xlu0 %363 }
 0x28a   :  { %528 = vrot.lane.b32.xlu0 %v5154_v21, %s4912_s27 }
 0x28d   :  { %v5158_v22 = vpop.permute.xlu1 %369  ;;  %v5160_v23 = vpop.permute.xlu0 %365 }
 0x28e   :  { %680 = vrot.lane.b32.xlu0 %v5152_v20, %s4912_s27  ;;  %604 = vrot.lane.b32.xlu1 %v5160_v23, %s4912_s27 }
 0x291   :  { %v5166_v24 = vpop.permute.xlu0 %371  ;;  %v5172_v25 = vpop.permute.xlu1 %373 }
 0x292   :  { %756 = vrot.lane.b32.xlu1 %v5158_v22, %s4912_s27  ;;  %832 = vrot.lane.b32.xlu0 %v5166_v24, %s4912_s27 }
 0x295   :  { %v376_v26 = vpop.permute.xlu0 %375  ;;  %v453_v27 = vpop.permute.xlu1 %452 }
 0x296   :  { %908 = vrot.lane.b32.xlu1 %v5172_v25, %s4912_s27  ;;  %4231 = vmatpush3.xpose.msk.msra.mxu0 %vm377_vm4, %v376_v26 }
 0x297   :  { %4235 = vmatprep.subr.mxu0 %v4907_v0 }
 0x299   :  { %4233 = vmatmul.mubr.msk.f32.vlgmr.msra.gmra.mxu0 %vm377_vm4, %v5132_v15 }
 0x29a   :  { %4236 = vmatpush3.xpose.msk.msra.mxu0 %vm377_vm4, %v453_v27  ;;  %4237 = vmatprep.mubr.msk.f32.mxu0 %vm4908_vm2, %v4907_v0 }
 0x29b   :  { %4240 = vmatprep.subr.mxu0 %v4907_v0 }
 0x29d   :  { %4238 = vmatmul.mubr.msk.f32.vlgmr.msra.gmra.mxu0 %vm377_vm4, %v5138_v18 }
 0x29e   :  { %4242 = vmatprep.mubr.msk.f32.mxu0 %vm4908_vm2, %v4907_v0 }
 0x2fc   :  { %v529_v28 = vpop.permute.xlu0 %528 }
 0x2fd   :  { %4241 = vmatpush3.xpose.msk.msra.mxu0 %vm377_vm4, %v529_v28 }
 0x2fe   :  { %4250 = vmatprep.subr.mxu0 %v4907_v0 }
 0x300   :  { %v605_v29 = vpop.permute.xlu1 %604  ;;  %4243 = vmatmul.mubr.msk.f32.vlgmr.msra.gmra.mxu0 %vm377_vm4, %v5154_v21  ;;  %v681_v30 = vpop.permute.xlu0 %680 }
 0x301   :  { %4246 = vmatpush3.xpose.msk.msra.mxu1 %vm377_vm4, %v605_v29  ;;  %4251 = vmatpush3.xpose.msk.msra.mxu0 %vm377_vm4, %v681_v30 }
 0x302   :  { %4252 = vmatprep.mubr.msk.f32.mxu0 %vm4908_vm2, %v4907_v0  ;;  %4255 = vmatprep.subr.mxu1 %v4907_v0 }
 0x303   :  { %4260 = vmatprep.subr.mxu0 %v4907_v0 }
 0x304   :  { %4248 = vmatmul.mubr.msk.f32.vlgmr.msra.gmra.mxu1 %vm377_vm4, %v5160_v23  ;;  %v757_v31 = vpop.permute.xlu1 %756  ;;  %4253 = vmatmul.mubr.msk.f32.vlgmr.msra.gmra.mxu0 %vm377_vm4, %v5152_v20  ;;  %v833_v32 = vpop.permute.xlu0 %832 }
 0x305   :  { %4256 = vmatpush3.xpose.msk.msra.mxu1 %vm377_vm4, %v757_v31  ;;  %4261 = vmatpush3.xpose.msk.msra.mxu0 %vm377_vm4, %v833_v32 }
 0x306   :  { %4257 = vmatprep.mubr.msk.f32.mxu1 %vm4908_vm2, %v4907_v0  ;;  %4262 = vmatprep.mubr.msk.f32.mxu0 %vm4908_vm2, %v4907_v0 }
 0x307   :  { %4265 = vmatprep.subr.mxu1 %v4907_v0  ;;  %4270 = vmatprep.subr.mxu0 %v4907_v0 }
 0x308   :  { %4258 = vmatmul.mubr.msk.f32.vlgmr.msra.gmra.mxu1 %vm377_vm4, %v5158_v22  ;;  %v909_v33 = vpop.permute.xlu1 %908  ;;  %4263 = vmatmul.mubr.msk.f32.vlgmr.msra.gmra.mxu0 %vm377_vm4, %v5166_v24 }
 0x309   :  { %4266 = vmatpush3.xpose.msk.msra.mxu1 %vm377_vm4, %v909_v33  ;;  %4267 = vmatprep.mubr.msk.f32.mxu1 %vm4908_vm2, %v4907_v0 }
 0x30a   :  { %4275 = vmatprep.subr.mxu1 %v4907_v0  ;;  %4272 = vmatprep.mubr.msk.f32.mxu0 %vm4908_vm2, %v4907_v0 }
 0x30c   :  { %4268 = vmatmul.mubr.msk.f32.vlgmr.msra.gmra.mxu1 %vm377_vm4, %v5172_v25 }
 0x30d   :  { %4277 = vmatprep.mubr.msk.f32.mxu1 %vm4908_vm2, %v4907_v0 }
 0x359   :  { %v448_v34 = vpop.f32.mrf.mxu0 }
 0x35a   :  { %v984_v35 = vmul.f32 0.35355338, %v448_v34 }
 0x35b   :  { %v4234_v36 = vpop.f32.mrf.mxu0 }
 0x35c   :  { %v992_v37 = vsel %vm377_vm4, %v984_v35, -inf }
 0x35d   :  { %993 = vmax.xlane.f32.xlu0 %v992_v37  ;;  %v524_v38 = vpop.f32.mrf.mxu0 }
 0x35e   :  { %v985_v39 = vmul.f32 0.35355338, %v524_v38 }
 0x35f   :  { %v4239_v40 = vpop.f32.mrf.mxu0 }
 0x360   :  { %v995_v41 = vsel %vm377_vm4, %v985_v39, -inf }
 0x361   :  { %996 = vmax.xlane.f32.xlu1 %v995_v41 }
 0x3c0   :  { %v600_v42 = vpop.f32.mrf.mxu0 }
 0x3c1   :  { %v986_v43 = vmul.f32 0.35355338, %v600_v42 }
 0x3c2   :  { %v4244_v44 = vpop.f32.mrf.mxu0 }
 0x3c3   :  { %v998_v45 = vsel %vm377_vm4, %v986_v43, -inf }
 0x3c4   :  { %999 = vmax.xlane.f32.xlu0 %v998_v45  ;;  %v676_v46 = vpop.f32.mrf.mxu1  ;;  %v752_v47 = vpop.f32.mrf.mxu0 }
 0x3c5   :  { %v987_v48 = vmul.f32 0.35355338, %v676_v46  ;;  %v988_v49 = vmul.f32 0.35355338, %v752_v47 }
 0x3c6   :  { %v4249_v50 = vpop.f32.mrf.mxu1  ;;  %v4254_v51 = vpop.f32.mrf.mxu0 }
 0x3c7   :  { %v1004_v52 = vsel %vm377_vm4, %v988_v49, -inf  ;;  %v1001_v53 = vsel %vm377_vm4, %v987_v48, -inf }
 0x3c8   :  { %1005 = vmax.xlane.f32.xlu1 %v1004_v52  ;;  %v904_v54 = vpop.f32.mrf.mxu0  ;;  %1002 = vmax.xlane.f32.xlu0 %v1001_v53  ;;  %v828_v55 = vpop.f32.mrf.mxu1 }
 0x3c9   :  { %v990_v56 = vmul.f32 0.35355338, %v904_v54  ;;  %v989_v57 = vmul.f32 0.35355338, %v828_v55 }
 0x3ca   :  { %v4259_v58 = vpop.f32.mrf.mxu1  ;;  %v4264_v59 = vpop.f32.mrf.mxu0 }
 0x3cb   :  { %v1010_v60 = vsel %vm377_vm4, %v990_v56, -inf  ;;  %v1007_v61 = vsel %vm377_vm4, %v989_v57, -inf }
 0x3cc   :  { %1011 = vmax.xlane.f32.xlu1 %v1010_v60  ;;  %1008 = vmax.xlane.f32.xlu0 %v1007_v61  ;;  %v980_v62 = vpop.f32.mrf.mxu1 }
 0x3cd   :  { %v991_v63 = vmul.f32 0.35355338, %v980_v62 }
 0x3ce   :  { %v4269_v1 = vpop.f32.mrf.mxu1 }
 0x3cf   :  { %v1013_v2 = vsel %vm377_vm4, %v991_v63, -inf }
 0x3d0   :  { %1014 = vmax.xlane.f32.xlu0 %v1013_v2 }
 0x3dd   :  { %1080 = vrot.lane.b32.xlu1 %v5132_v15, %s4913_s11 }
 0x3e1   :  { %1232 = vrot.lane.b32.xlu1 %v5154_v21, %s4913_s11 }
 0x3e5   :  { %1308 = vrot.lane.b32.xlu1 %v5160_v23, %s4913_s11 }
 0x3e6   :  { %1156 = vrot.lane.b32.xlu0 %v5138_v18, %s4913_s11  ;;  %v994_v5 = vpop.xlane.xlu0 %993 }
 0x3e7   :  { %v1016_v6 = vsub.f32 %v984_v35, %v994_v5 }
 0x3e9   :  { %1460 = vrot.lane.b32.xlu1 %v5158_v22, %s4913_s11  ;;  %v1024_v8 = vmul.f32 1.442695, %v1016_v6 }
 0x3ea   :  { %1384 = vrot.lane.b32.xlu0 %v5152_v20, %s4913_s11  ;;  %v997_v3 = vpop.xlane.xlu1 %996 }
 0x3eb   :  { %v1017_v4 = vsub.f32 %v985_v39, %v997_v3 }
 0x3ed   :  { %v1026_v7 = vmul.f32 1.442695, %v1017_v4 }
 0x3ef   :  { %4545 = vpow2.f32 %v1026_v7 }
 0x3f0   :  { %4547 = vpow2.f32 %v1024_v8 }
 0x3fc   :  { %v5244_v9 = vpop.eup %4545 }
 0x3fd   :  { %v1043_v12 = vsel %vm377_vm4, %v5244_v9, 0.0  ;;  %v5248_v13 = vpop.eup %4547 }
 0x3fe   :  { %v1040_v14 = vsel %vm377_vm4, %v5248_v13, 0.0 }
 0x409   :  { %1044 = vadd.xlane.f32.xlu0 %v1043_v12 }
 0x40d   :  { %1041 = vadd.xlane.f32.xlu1 %v1040_v14 }
 0x44d   :  { %v1000_v15 = vpop.xlane.xlu0 %999 }
 0x44e   :  { %v1018_v16 = vsub.f32 %v986_v43, %v1000_v15 }
 0x450   :  { %v1028_v17 = vmul.f32 1.442695, %v1018_v16 }
 0x451   :  { %v1006_v18 = vpop.xlane.xlu1 %1005  ;;  %v1003_v19 = vpop.xlane.xlu0 %1002 }
 0x452   :  { %4549 = vpow2.f32 %v1028_v17  ;;  %v1020_v20 = vsub.f32 %v988_v49, %v1006_v18  ;;  %v1019_v21 = vsub.f32 %v987_v48, %v1003_v19 }
 0x454   :  { %v1032_v22 = vmul.f32 1.442695, %v1020_v20  ;;  %v1030_v23 = vmul.f32 1.442695, %v1019_v21  ;;  %v1722_v20 = vld [vmem:[#allocation5 + $0x10] sm:$0xff]  ;;  %v1723_v21 = vld [vmem:[#allocation5 + $0x18] sm:$0xff] }
 0x455   :  { %v1012_v26 = vpop.xlane.xlu1 %1011  ;;  %v1009_v27 = vpop.xlane.xlu0 %1008 }
 0x456   :  { %4551 = vpow2.f32 %v1032_v22  ;;  %v1022_v28 = vsub.f32 %v990_v56, %v1012_v26  ;;  %v1021_v29 = vsub.f32 %v989_v57, %v1009_v27  ;;  %v1720_v27 = vld [vmem:[#allocation5] sm:$0xff] }
 0x457   :  { %4553 = vpow2.f32 %v1030_v23  ;;  %v1726_v23 = vpack.c.bf16 %v1723_v21, %v1722_v20 }
 0x458   :  { %v1036_v30 = vmul.f32 1.442695, %v1022_v28  ;;  %v1034_v31 = vmul.f32 1.442695, %v1021_v29  ;;  %v1721_v28 = vld [vmem:[#allocation5 + $0x8] sm:$0xff] }
 0x459   :  { %v1081_v32 = vpop.permute.xlu1 %1080  ;;  %v1015_v33 = vpop.xlane.xlu0 %1014 }
 0x45a   :  { %4555 = vpow2.f32 %v1036_v30  ;;  %v1023_v34 = vsub.f32 %v991_v63, %v1015_v33  ;;  %4271 = vmatpush3.msra.mxu0 %v1081_v32  ;;  %v1725_v30 = vpack.c.bf16 %v1721_v28, %v1720_v27  ;;  %v1949_v28 = vld [vmem:[#allocation2 + $0x30] sm:$0xff] }
 0x45b   :  { %4557 = vpow2.f32 %v1034_v31  ;;  %4280 = vmatprep.subr.mxu0 %v4907_v0 }
 0x45c   :  { %v1038_v35 = vmul.f32 1.442695, %v1023_v34 }
 0x45d   :  { %v1157_v36 = vpop.permute.xlu0 %1156  ;;  %v1233_v49 = vpop.permute.xlu1 %1232 }
 0x45e   :  { %4559 = vpow2.f32 %v1038_v35  ;;  %4276 = vmatpush3.msra.mxu1 %v1157_v36 }
 0x45f   :  { %v4550_v37 = vpop.eup %4549  ;;  %4285 = vmatprep.subr.mxu1 %v4907_v0 }
 0x460   :  { %v1046_v38 = vsel %vm377_vm4, %v4550_v37, 0.0 }
 0x461   :  { %1047 = vadd.xlane.f32.xlu1 %v1046_v38  ;;  %v1309_v50 = vpop.permute.xlu1 %1308  ;;  %v1385_v51 = vpop.permute.xlu0 %1384 }
 0x463   :  { %v4552_v39 = vpop.eup %4551 }
 0x464   :  { %v4554_v40 = vpop.eup %4553  ;;  %v1052_v41 = vsel %vm377_vm4, %v4552_v39, 0.0 }
 0x465   :  { %1053 = vadd.xlane.f32.xlu1 %v1052_v41  ;;  %v1049_v42 = vsel %vm377_vm4, %v4554_v40, 0.0  ;;  %v1461_v52 = vpop.permute.xlu1 %1460 }
 0x466   :  { %1050 = vadd.xlane.f32.xlu0 %v1049_v42 }
 0x467   :  { %v4556_v43 = vpop.eup %4555 }
 0x468   :  { %v5257_v44 = vpop.eup %4557  ;;  %v1058_v45 = vsel %vm377_vm4, %v4556_v43, 0.0 }
 0x469   :  { %1059 = vadd.xlane.f32.xlu1 %v1058_v45  ;;  %v1055_v46 = vsel %vm377_vm4, %v5257_v44, 0.0 }
 0x46a   :  { %1056 = vadd.xlane.f32.xlu0 %v1055_v46 }
 0x46b   :  { %v5262_v47 = vpop.eup %4559 }
 0x46c   :  { %v1061_v48 = vsel %vm377_vm4, %v5262_v47, 0.0 }
 0x46e   :  { %1062 = vadd.xlane.f32.xlu0 %v1061_v48 }
 0x47a   :  { %1612 = vrot.lane.b32.xlu1 %v5172_v25, %s4913_s11 }
 0x484   :  { %1536 = vrot.lane.b32.xlu0 %v5166_v24, %s4913_s11 }
 0x492   :  { %v1045_v53 = vpop.xlane.xlu0 %1044 }
 0x493   :  { %4561 = vrcp.f32 %v1045_v53 }
 0x496   :  { %v1042_v54 = vpop.xlane.xlu1 %1041 }
 0x497   :  { %4563 = vrcp.f32 %v1042_v54 }
 0x4a0   :  { %v4562_v55 = vpop.eup %4561 }
 0x4a1   :  { %v1073_v56 = vmul.f32 %v4562_v55, %v5244_v9 }
 0x4a3   :  { %4278 = vmatmul.mubr.msk.f32.vlgmr.msra.gmra.mxu1 %vm377_vm4, %v1073_v56 }
 0x4a4   :  { %v4564_v57 = vpop.eup %4563  ;;  %4286 = vmatpush3.msra.mxu1 %v1309_v50  ;;  %4287 = vmatprep.mubr.msk.f32.mxu1 %vm4908_vm2, %v4907_v0 }
 0x4a5   :  { %v1072_v24 = vmul.f32 %v4564_v57, %v5248_v13  ;;  %4295 = vmatprep.subr.mxu1 %v4907_v0 }
 0x4a7   :  { %4273 = vmatmul.mubr.msk.f32.vlgmr.msra.gmra.mxu0 %vm377_vm4, %v1072_v24 }
 0x4a8   :  { %4281 = vmatpush3.msra.mxu0 %v1233_v49  ;;  %4282 = vmatprep.mubr.msk.f32.mxu0 %vm4908_vm2, %v4907_v0 }
 0x4a9   :  { %4290 = vmatprep.subr.mxu0 %v4907_v0 }
 0x4ea   :  { %v1048_v25 = vpop.xlane.xlu1 %1047 }
 0x4eb   :  { %4565 = vrcp.f32 %v1048_v25  ;;  %v1782_v25 = vld [vmem:[#allocation7 + $0x10] sm:$0xff] }
 0x4ee   :  { %v1054_v58 = vpop.xlane.xlu1 %1053 }
 0x4ef   :  { %4567 = vrcp.f32 %v1054_v58  ;;  %v1051_v59 = vpop.xlane.xlu0 %1050  ;;  %v1783_v58 = vld [vmem:[#allocation7 + $0x18] sm:$0xff] }
 0x4f0   :  { %4569 = vrcp.f32 %v1051_v59  ;;  %v1786_v59 = vpack.c.bf16 %v1783_v58, %v1782_v25 }
 0x4f2   :  { %v1060_v60 = vpop.xlane.xlu1 %1059 }
 0x4f3   :  { %4571 = vrcp.f32 %v1060_v60  ;;  %v1057_v61 = vpop.xlane.xlu0 %1056  ;;  %v1780_v60 = vld [vmem:[#allocation7] sm:$0xff] }
 0x4f4   :  { %4573 = vrcp.f32 %v1057_v61  ;;  %v1781_v61 = vld [vmem:[#allocation7 + $0x8] sm:$0xff] }
 0x4f6   :  { %v1613_v13 = vpop.permute.xlu1 %1612 }
 0x4f7   :  { %v1063_v62 = vpop.xlane.xlu0 %1062 }
 0x4f8   :  { %v4566_v63 = vpop.eup %4565  ;;  %4575 = vrcp.f32 %v1063_v62  ;;  %v1785_v62 = vpack.c.bf16 %v1781_v61, %v1780_v60 }
 0x4f9   :  { %v1074_v1 = vmul.f32 %v4566_v63, %v4550_v37  ;;  %v4053_v63 = vld [vmem:[%s5677_s1] ss:$0 sm:$0xff] }
 0x4fb   :  { %4283 = vmatmul.mubr.msk.f32.vlgmr.msra.gmra.mxu0 %vm377_vm4, %v1074_v1  ;;  %v1537_v6 = vpop.permute.xlu0 %1536 }
 0x4fc   :  { %v4568_v2 = vpop.eup %4567  ;;  %4291 = vmatpush3.msra.mxu0 %v1385_v51  ;;  %4292 = vmatprep.mubr.msk.f32.mxu0 %vm4908_vm2, %v4907_v0 }
 0x4fd   :  { %v4570_v3 = vpop.eup %4569  ;;  %4300 = vmatprep.subr.mxu0 %v4907_v0  ;;  %v1076_v4 = vmul.f32 %v4568_v2, %v4552_v39 }
 0x4fe   :  { %v1075_v5 = vmul.f32 %v4570_v3, %v4554_v40 }
 0x4ff   :  { %4293 = vmatmul.mubr.msk.f32.vlgmr.msra.gmra.mxu0 %vm377_vm4, %v1076_v4 }
 0x500   :  { %v4572_v7 = vpop.eup %4571  ;;  %4288 = vmatmul.mubr.msk.f32.vlgmr.msra.gmra.mxu1 %vm377_vm4, %v1075_v5  ;;  %4301 = vmatpush3.msra.mxu0 %v1537_v6 }
 0x501   :  { %v4574_v8 = vpop.eup %4573  ;;  %4296 = vmatpush3.msra.mxu1 %v1461_v52  ;;  %4297 = vmatprep.mubr.msk.f32.mxu1 %vm4908_vm2, %v4907_v0  ;;  %v1078_v9 = vmul.f32 %v4572_v7, %v4556_v43 }
 0x502   :  { %4302 = vmatprep.mubr.msk.f32.mxu0 %vm4908_vm2, %v4907_v0  ;;  %4305 = vmatprep.subr.mxu1 %v4907_v0  ;;  %v1077_v12 = vmul.f32 %v4574_v8, %v5257_v44 }
 0x503   :  { %4303 = vmatmul.mubr.msk.f32.vlgmr.msra.gmra.mxu0 %vm377_vm4, %v1078_v9  ;;  %4310 = vmatprep.subr.bf16.mxu0 %v4907_v0 }
 0x504   :  { %4298 = vmatmul.mubr.msk.f32.vlgmr.msra.gmra.mxu1 %vm377_vm4, %v1077_v12  ;;  %4314 = vmatprep.mubr.msk.bf16.mxu0 %vm4908_vm2, %v4907_v0  ;;  %v1842_v12 = vld [vmem:[#allocation8 + $0x10] sm:$0xff] }
 0x505   :  { %v4576_v14 = vpop.eup %4575  ;;  %4306 = vmatpush3.msra.mxu1 %v1613_v13  ;;  %4307 = vmatprep.mubr.msk.f32.mxu1 %vm4908_vm2, %v4907_v0  ;;  %v1843_v13 = vld [vmem:[#allocation8 + $0x18] sm:$0xff] }
 0x506   :  { %v1079_v15 = vmul.f32 %v4576_v14, %v5262_v47  ;;  %4318 = vmatprep.subr.bf16.mxu1 %v4907_v0  ;;  %4311 = vmatpush3.bf16.msra.mxu0 %v1726_v23  ;;  %v1846_v14 = vpack.c.bf16 %v1843_v13, %v1842_v12  ;;  %v4059_v12 = vld [vmem:[#allocation13] ss:$0 sm:$0xff] }
 0x507   :  { %4312 = vmatprep.subr.bf16.mxu0 %v4907_v0 }
 0x508   :  { %4308 = vmatmul.mubr.msk.f32.vlgmr.msra.gmra.mxu1 %vm377_vm4, %v1079_v15  ;;  %v1840_v15 = vld [vmem:[#allocation8] sm:$0xff] }
 0x509   :  { %4322 = vmatprep.mubr.msk.bf16.mxu1 %vm4908_vm2, %v4907_v0  ;;  %4319 = vmatpush3.bf16.msra.mxu1 %v1786_v59 }
 0x50a   :  { %4313 = vmatpush3.bf16.msra.mxu0 %v1725_v30  ;;  %4320 = vmatprep.subr.bf16.mxu1 %v4907_v0 }
 0x50b   :  { %4326 = vmatprep.subr.bf16.mxu0 %v4907_v0 }
 0x50d   :  { %4321 = vmatpush3.bf16.msra.mxu1 %v1785_v62 }
 0x50e   :  { %4334 = vmatprep.subr.bf16.mxu1 %v4907_v0 }
 0x563   :  { %v1228_v16 = vpop.f32.mrf.mxu1 }
 0x565   :  { %v4279_v17 = vpop.f32.mrf.mxu1 }
 0x567   :  { %v1152_v18 = vpop.f32.mrf.mxu0 }
 0x569   :  { %v4274_v19 = vpop.f32.mrf.mxu0 }
 0x5bb   :  { %v1304_v22 = vpop.f32.mrf.mxu0 }
 0x5bd   :  { %v4284_v26 = vpop.f32.mrf.mxu0 }
 0x5bf   :  { %v1456_v29 = vpop.f32.mrf.mxu0 }
 0x5c0   :  { %v1380_v31 = vpop.f32.mrf.mxu1 }
 0x5c1   :  { %v4515_v32 = vpack.i.bf16 %v1380_v31, %v1304_v22  ;;  %v4294_v33 = vpop.f32.mrf.mxu0  ;;  %v1947_v31 = vld [vmem:[#allocation2 + $0x20] sm:$0xff] }
 0x5c2   :  { %v4289_v34 = vpop.f32.mrf.mxu1 }
 0x5c3   :  { %4516 = vrot.lane.b32.xlu0 %v4515_v32, %s4896_s29  ;;  %v1608_v35 = vpop.f32.mrf.mxu0  ;;  %v1948_v32 = vld [vmem:[#allocation2 + $0x28] sm:$0xff]  ;;  %v4057_v34 = vld [vmem:[#allocation10] ss:$0 sm:$0xff] }
 0x5c4   :  { %v1532_v36 = vpop.f32.mrf.mxu1  ;;  %v1952_v33 = vpack.c.bf16 %v1948_v32, %v1947_v31 }
 0x5c5   :  { %v4520_v37 = vpack.i.bf16 %v1532_v36, %v1456_v29  ;;  %v4304_v38 = vpop.f32.mrf.mxu0  ;;  %v1950_v29 = vld [vmem:[#allocation2 + $0x38] sm:$0xff] }
 0x5c6   :  { %v4299_v39 = vpop.f32.mrf.mxu1  ;;  %v1953_v30 = vpack.c.bf16 %v1950_v29, %v1949_v28 }
 0x5c7   :  { %4521 = vrot.lane.b32.xlu1 %v4520_v37, %s4899_s0 }
 0x5c8   :  { %v1684_v40 = vpop.f32.mrf.mxu1 }
 0x5c9   :  { %v4525_v41 = vpack.i.bf16 %v1684_v40, %v1608_v35 }
 0x5ca   :  { %v4309_v42 = vpop.f32.mrf.mxu1 }
 0x5cb   :  { %4526 = vrot.lane.b32.xlu0 %v4525_v41, %s4914_s7 }
 0x635   :  { %v4517_v43 = vpop.permute.xlu0 %4516 }
 0x636   :  { %v4519_v45 = vunpack.i.h.bf16 %v4517_v43  ;;  %v4518_v46 = vunpack.i.l.bf16 %v4517_v43 }
 0x638   :  { %v1713_v50 = vsel %vm377_vm4, %v1228_v16, %v4519_v45  ;;  %v1712_v51 = vsel %vm377_vm4, %v1152_v18, %v4518_v46  ;;  %v1841_v16 = vld [vmem:[#allocation8 + $0x8] sm:$0xff] }
 0x639   :  { %v4522_v44 = vpop.permute.xlu1 %4521  ;;  %v1845_v17 = vpack.c.bf16 %v1841_v16, %v1840_v15 }
 0x63a   :  { %v4524_v47 = vunpack.i.h.bf16 %v4522_v44  ;;  %v4523_v48 = vunpack.i.l.bf16 %v4522_v44 }
 0x63c   :  { %v1716_v54 = vsel %vm1714_vm5, %v1713_v50, %v4524_v47  ;;  %v1715_v55 = vsel %vm1714_vm5, %v1712_v51, %v4523_v48 }
 0x63d   :  { %v4527_v49 = vpop.permute.xlu0 %4526 }
 0x63e   :  { %v4529_v52 = vunpack.i.h.bf16 %v4527_v49  ;;  %v4528_v53 = vunpack.i.l.bf16 %v4527_v49 }
 0x640   :  { %v1719_v56 = vsel %vm1717_vm6, %v1716_v54, %v4529_v52  ;;  %v1718_v57 = vsel %vm1717_vm6, %v1715_v55, %v4528_v53 }
 0x641   :  { %v1724_v24 = vpack.c.bf16 %v1719_v56, %v1718_v57 }
 0x643   :  { %4315 = vmatmul.mubr.msk.bf16.vlgmr.msra.gmra.mxu0 %vm316_vm3, %v1724_v24 }
 0x644   :  { %4330 = vmatprep.mubr.msk.bf16.mxu0 %vm4908_vm2, %v4907_v0  ;;  %4327 = vmatpush3.bf16.msra.mxu0 %v1846_v14 }
 0x645   :  { %4328 = vmatprep.subr.bf16.mxu0 %v4907_v0 }
 0x648   :  { %4329 = vmatpush3.bf16.msra.mxu0 %v1845_v17 }
 0x649   :  { %4342 = vmatprep.subr.mxu0 %v4907_v0 }
 0x703   :  { %v1771_v1 = vpop.f32.mrf.mxu0 }
 0x704   :  { %v1772_v3 = vadd.f32 %v4053_v63, %v1771_v1 }
 0x705   :  { %v4316_v2 = vpop.f32.mrf.mxu0 }
 0x706   :  { %v1778_v7 = vadd.f32 %v1772_v3, %v5122_v11  ;;  %v1930_v3 = vlaneseq }
 0x707   :  { %v1774_v4 = vpop.f32.mrf.mxu0 }
 0x708   :  { %v1775_v5 = vadd.f32 %v4053_v63, %v1774_v4  ;;  %v1931_v4 = vshrl.u32 %v1930_v3, 7 }
 0x709   :  { %v4317_v6 = vpop.f32.mrf.mxu0 }
 0x70a   :  { %v1779_v8 = vadd.f32 %v5120_v10, %v1775_v5  ;;  %v4055_v10 = vld [vmem:[%s5678_s30] ss:$0 sm:$0xff]  ;;  %v1925_v5 = vld [vmem:[#allocation11] sm:$0x1]  ;;  %v5342_v6 = vsub.s32 0, %v1931_v4 }
 0x70c   :  { %v1784_v9 = vpack.c.bf16 %v1779_v8, %v1778_v7 }
 0x70e   :  { %4323 = vmatmul.mubr.msk.bf16.vlgmr.msra.gmra.mxu1 %vm316_vm3, %v1784_v9 }
 0x70f   :  { %4338 = vmatprep.mubr.msk.bf16.mxu1 %vm4908_vm2, %v4907_v0  ;;  %4335 = vmatpush3.bf16.msra.mxu1 %v1953_v30 }
 0x710   :  { %4336 = vmatprep.subr.bf16.mxu1 %v4907_v0 }
 0x713   :  { %4337 = vmatpush3.bf16.msra.mxu1 %v1952_v33 }
 0x714   :  { %4347 = vmatprep.subr.mxu1 %v4907_v0 }
 0x7ce   :  { %v1831_v11 = vpop.f32.mrf.mxu1 }
 0x7cf   :  { %v1832_v19 = vadd.f32 %v4055_v10, %v1831_v11 }
 0x7d0   :  { %v4324_v18 = vpop.f32.mrf.mxu1 }
 0x7d1   :  { %v1838_v23 = vmax.f32 %v1832_v19, 0.0 }
 0x7d2   :  { %v1834_v20 = vpop.f32.mrf.mxu1 }
 0x7d3   :  { %v1835_v21 = vadd.f32 %v4055_v10, %v1834_v20  ;;  %v4061_v10 = vld [vmem:[%s5676_s25 + $0x1] ss:$0 sm:$0xff] }
 0x7d4   :  { %v4325_v22 = vpop.f32.mrf.mxu1 }
 0x7d5   :  { %v1839_v26 = vmax.f32 %v1835_v21, 0.0 }
 0x7d7   :  { %v1844_v27 = vpack.c.bf16 %v1839_v26, %v1838_v23 }
 0x7d9   :  { %4331 = vmatmul.mubr.msk.bf16.vlgmr.msra.gmra.mxu0 %vm316_vm3, %v1844_v27 }
 0x7da   :  { %4344 = vmatprep.mubr.msk.f32.mxu0 %vm4908_vm2, %v4907_v0 }
 0x899   :  { %v1891_v35 = vpop.f32.mrf.mxu0 }
 0x89a   :  { %v1892_v36 = vadd.f32 %v4057_v34, %v1891_v35 }
 0x89b   :  { %v4332_v37 = vpop.f32.mrf.mxu0 }
 0x89c   :  { %v1898_v39 = vadd.f32 %v1892_v36, %v1778_v7 }
 0x89d   :  { %v1894_v38 = vpop.f32.mrf.mxu0 }
 0x89e   :  { %v1895_v40 = vadd.f32 %v4057_v34, %v1894_v38  ;;  %v1900_v43 = vsel %vm316_vm3, %v1898_v39, 0.0 }
 0x89f   :  { %v4333_v41 = vpop.f32.mrf.mxu0 }
 0x8a0   :  { %v1899_v42 = vadd.f32 %v1895_v40, %v1779_v8 }
 0x8a2   :  { %v1901_v44 = vsel %vm316_vm3, %v1899_v42, 0.0 }
 0x8a3   :  { %v1902_v45 = vadd.f32 %v1901_v44, %v1900_v43 }
 0x8a5   :  { %v1903_v46 = vrot.slane %v1902_v45, 4 }
 0x8a7   :  { %v1904_v47 = vadd.f32 %v1903_v46, %v1902_v45 }
 0x8a9   :  { %v1905_v48 = vrot.slane %v1904_v47, 2 }
 0x8ab   :  { %v1906_v49 = vadd.f32 %v1905_v48, %v1904_v47 }
 0x8ad   :  { %v1907_v50 = vrot.slane %v1906_v49, 1 }
 0x8af   :  { %v1908_v51 = vadd.f32 %v1907_v50, %v1906_v49 }
 0x8b1   :  { %v1910_v52 = vmul.f32 0.0625, %v1908_v51 }
 0x8b3   :  { %v1911_v53 = vsub.f32 %v1898_v39, %v1910_v52  ;;  %v1912_v54 = vsub.f32 %v1899_v42, %v1910_v52 }
 0x8b5   :  { %v1913_v55 = vmul.f32 %v1911_v53, %v1911_v53  ;;  %v1914_v56 = vmul.f32 %v1912_v54, %v1912_v54 }
 0x8b7   :  { %v1915_v57 = vsel %vm316_vm3, %v1913_v55, 0.0  ;;  %v1916_v24 = vsel %vm316_vm3, %v1914_v56, 0.0 }
 0x8b8   :  { %v1917_v25 = vadd.f32 %v1916_v24, %v1915_v57 }
 0x8ba   :  { %v1918_v58 = vrot.slane %v1917_v25, 4 }
 0x8bc   :  { %v1919_v59 = vadd.f32 %v1918_v58, %v1917_v25 }
 0x8be   :  { %v1920_v60 = vrot.slane %v1919_v59, 2 }
 0x8c0   :  { %v1921_v61 = vadd.f32 %v1920_v60, %v1919_v59 }
 0x8c2   :  { %v1922_v62 = vrot.slane %v1921_v61, 1 }
 0x8c4   :  { %v1923_v63 = vadd.f32 %v1922_v62, %v1921_v61 }
 0x8c6   :  { %v1924_v1 = vmul.f32 0.0625, %v1923_v63 }
 0x8c8   :  { %v1926_v2 = vadd.f32 1e-05, %v1924_v1 }
 0x8ca   :  { %4577 = vrsqrt.f32 %v1926_v2 }
 0x8d7   :  { %v4578_v7 = vpop.eup %4577 }
 0x8d8   :  { %v1928_v8 = vmul.f32 %v4578_v7, %v1925_v5 }
 0x8da   :  { %v1933_v9 = vrot.slane %v1928_v8, %v5342_v6 }
 0x8dc   :  { %v1935_v13 = vmul.f32 %v1933_v9, %v1911_v53  ;;  %v1936_v14 = vmul.f32 %v1933_v9, %v1912_v54 }
 0x8de   :  { %v5345_v15 = vadd.f32 %v4059_v12, %v1935_v13  ;;  %v5347_v16 = vadd.f32 %v4059_v12, %v1936_v14 }
 0x8e0   :  { %v1951_v17 = vpack.c.bf16 %v5347_v16, %v5345_v15 }
 0x8e2   :  { %4339 = vmatmul.mubr.msk.bf16.vlgmr.msra.gmra.mxu1 %vm316_vm3, %v1951_v17 }
 0x8e3   :  { %4349 = vmatprep.mubr.msk.f32.mxu1 %vm4908_vm2, %v4907_v0 }
 0x9a2   :  { %v1999_v11 = vpop.f32.mrf.mxu1 }
 0x9a3   :  { %v5357_v18 = vadd.f32 %v4061_v10, %v1999_v11 }
 0x9a4   :  { %v4340_v19 = vpop.f32.mrf.mxu1 }
 0x9a5   :  { %2008 = vrot.lane.b32.xlu1 %v5357_v18, %s4910_s9 }
 0x9a6   :  { %v2002_v20 = vpop.f32.mrf.mxu1 }
 0x9a7   :  { %v5361_v21 = vadd.f32 %v4061_v10, %v2002_v20 }
 0x9a8   :  { %v4341_v22 = vpop.f32.mrf.mxu1 }
 0x9a9   :  { %2012 = vrot.lane.b32.xlu1 %v5357_v18, %s4909_s8  ;;  %2010 = vrot.lane.b32.xlu0 %v5361_v21, %s4910_s9 }
 0x9ad   :  { %2016 = vrot.lane.b32.xlu1 %v5357_v18, %s4911_s4  ;;  %2014 = vrot.lane.b32.xlu0 %v5361_v21, %s4909_s8 }
 0x9b1   :  { %2020 = vrot.lane.b32.xlu1 %v5357_v18, %s4912_s27  ;;  %2018 = vrot.lane.b32.xlu0 %v5361_v21, %s4911_s4 }
 0x9b5   :  { %2096 = vrot.lane.b32.xlu0 %v5361_v21, %s4912_s27 }
 0xa17   :  { %v5377_v23 = vpop.permute.xlu1 %2008 }
 0xa18   :  { %2172 = vrot.lane.b32.xlu1 %v5377_v23, %s4912_s27 }
 0xa1b   :  { %v5381_v26 = vpop.permute.xlu1 %2012  ;;  %v5383_v27 = vpop.permute.xlu0 %2010 }
 0xa1c   :  { %2324 = vrot.lane.b32.xlu1 %v5381_v26, %s4912_s27  ;;  %2248 = vrot.lane.b32.xlu0 %v5383_v27, %s4912_s27 }
 0xa1f   :  { %v5389_v28 = vpop.permute.xlu1 %2016  ;;  %v5391_v29 = vpop.permute.xlu0 %2014 }
 0xa20   :  { %2476 = vrot.lane.b32.xlu1 %v5389_v28, %s4912_s27  ;;  %2400 = vrot.lane.b32.xlu0 %v5391_v29, %s4912_s27 }
 0xa23   :  { %v2021_v30 = vpop.permute.xlu1 %2020  ;;  %v5397_v31 = vpop.permute.xlu0 %2018 }
 0xa24   :  { %4343 = vmatpush3.xpose.msk.msra.mxu0 %vm377_vm4, %v2021_v30  ;;  %2552 = vrot.lane.b32.xlu0 %v5397_v31, %s4912_s27 }
 0xa25   :  { %4352 = vmatprep.subr.mxu0 %v4907_v0 }
 0xa27   :  { %4345 = vmatmul.mubr.msk.f32.vlgmr.msra.gmra.mxu0 %vm377_vm4, %v5357_v18  ;;  %v2097_v32 = vpop.permute.xlu0 %2096 }
 0xa28   :  { %4348 = vmatpush3.xpose.msk.msra.mxu1 %vm377_vm4, %v2097_v32  ;;  %4354 = vmatprep.mubr.msk.f32.mxu0 %vm4908_vm2, %v4907_v0 }
 0xa29   :  { %4357 = vmatprep.subr.mxu1 %v4907_v0 }
 0xa2b   :  { %4350 = vmatmul.mubr.msk.f32.vlgmr.msra.gmra.mxu1 %vm377_vm4, %v5361_v21 }
 0xa2c   :  { %4359 = vmatprep.mubr.msk.f32.mxu1 %vm4908_vm2, %v4907_v0 }
 0xa8a   :  { %v2173_v33 = vpop.permute.xlu1 %2172 }
 0xa8b   :  { %4353 = vmatpush3.xpose.msk.msra.mxu0 %vm377_vm4, %v2173_v33 }
 0xa8c   :  { %4362 = vmatprep.subr.mxu0 %v4907_v0 }
 0xa8e   :  { %4355 = vmatmul.mubr.msk.f32.vlgmr.msra.gmra.mxu0 %vm377_vm4, %v5377_v23  ;;  %v2325_v34 = vpop.permute.xlu1 %2324  ;;  %v2249_v35 = vpop.permute.xlu0 %2248 }
 0xa8f   :  { %4358 = vmatpush3.xpose.msk.msra.mxu1 %vm377_vm4, %v2249_v35  ;;  %4363 = vmatpush3.xpose.msk.msra.mxu0 %vm377_vm4, %v2325_v34 }
 0xa90   :  { %4364 = vmatprep.mubr.msk.f32.mxu0 %vm4908_vm2, %v4907_v0  ;;  %4372 = vmatprep.subr.mxu0 %v4907_v0 }
 0xa91   :  { %4367 = vmatprep.subr.mxu1 %v4907_v0 }
 0xa92   :  { %4365 = vmatmul.mubr.msk.f32.vlgmr.msra.gmra.mxu0 %vm377_vm4, %v5381_v26  ;;  %v2477_v36 = vpop.permute.xlu1 %2476  ;;  %4360 = vmatmul.mubr.msk.f32.vlgmr.msra.gmra.mxu1 %vm377_vm4, %v5383_v27  ;;  %v2401_v37 = vpop.permute.xlu0 %2400 }
 0xa93   :  { %4368 = vmatpush3.xpose.msk.msra.mxu1 %vm377_vm4, %v2401_v37  ;;  %4373 = vmatpush3.xpose.msk.msra.mxu0 %vm377_vm4, %v2477_v36 }
 0xa94   :  { %4369 = vmatprep.mubr.msk.f32.mxu1 %vm4908_vm2, %v4907_v0  ;;  %4374 = vmatprep.mubr.msk.f32.mxu0 %vm4908_vm2, %v4907_v0 }
 0xa95   :  { %4377 = vmatprep.subr.mxu1 %v4907_v0  ;;  %4382 = vmatprep.subr.mxu0 %v4907_v0 }
 0xa96   :  { %4370 = vmatmul.mubr.msk.f32.vlgmr.msra.gmra.mxu1 %vm377_vm4, %v5391_v29  ;;  %4375 = vmatmul.mubr.msk.f32.vlgmr.msra.gmra.mxu0 %vm377_vm4, %v5389_v28  ;;  %v2553_v38 = vpop.permute.xlu0 %2552 }
 0xa97   :  { %4378 = vmatpush3.xpose.msk.msra.mxu1 %vm377_vm4, %v2553_v38  ;;  %4379 = vmatprep.mubr.msk.f32.mxu1 %vm4908_vm2, %v4907_v0 }
 0xa98   :  { %4387 = vmatprep.subr.mxu1 %v4907_v0  ;;  %4384 = vmatprep.mubr.msk.f32.mxu0 %vm4908_vm2, %v4907_v0 }
 0xa9a   :  { %4380 = vmatmul.mubr.msk.f32.vlgmr.msra.gmra.mxu1 %vm377_vm4, %v5397_v31 }
 0xa9b   :  { %4389 = vmatprep.mubr.msk.f32.mxu1 %vm4908_vm2, %v4907_v0 }
 0xae7   :  { %v2092_v39 = vpop.f32.mrf.mxu0 }
 0xae8   :  { %v2628_v40 = vmul.f32 0.35355338, %v2092_v39 }
 0xae9   :  { %v4346_v41 = vpop.f32.mrf.mxu0 }
 0xaea   :  { %v2636_v42 = vsel %vm377_vm4, %v2628_v40, -inf }
 0xaeb   :  { %2637 = vmax.xlane.f32.xlu1 %v2636_v42  ;;  %v2168_v43 = vpop.f32.mrf.mxu1 }
 0xaec   :  { %v2629_v44 = vmul.f32 0.35355338, %v2168_v43 }
 0xaed   :  { %v4351_v45 = vpop.f32.mrf.mxu1 }
 0xaee   :  { %v2639_v46 = vsel %vm377_vm4, %v2629_v44, -inf }
 0xaef   :  { %2640 = vmax.xlane.f32.xlu0 %v2639_v46 }
 0xb4e   :  { %v2244_v47 = vpop.f32.mrf.mxu0 }
 0xb4f   :  { %v2630_v48 = vmul.f32 0.35355338, %v2244_v47 }
 0xb50   :  { %v4356_v49 = vpop.f32.mrf.mxu0 }
 0xb51   :  { %v2642_v50 = vsel %vm377_vm4, %v2630_v48, -inf }
 0xb52   :  { %v2396_v51 = vpop.f32.mrf.mxu0  ;;  %2643 = vmax.xlane.f32.xlu0 %v2642_v50  ;;  %v2320_v52 = vpop.f32.mrf.mxu1 }
 0xb53   :  { %v2632_v53 = vmul.f32 0.35355338, %v2396_v51  ;;  %v2631_v54 = vmul.f32 0.35355338, %v2320_v52 }
 0xb54   :  { %v4361_v55 = vpop.f32.mrf.mxu1  ;;  %v4366_v56 = vpop.f32.mrf.mxu0 }
 0xb55   :  { %v2648_v57 = vsel %vm377_vm4, %v2632_v53, -inf  ;;  %v2645_v24 = vsel %vm377_vm4, %v2631_v54, -inf }
 0xb56   :  { %v2548_v25 = vpop.f32.mrf.mxu0  ;;  %2649 = vmax.xlane.f32.xlu0 %v2648_v57  ;;  %2646 = vmax.xlane.f32.xlu1 %v2645_v24  ;;  %v2472_v58 = vpop.f32.mrf.mxu1 }
 0xb57   :  { %v2634_v59 = vmul.f32 0.35355338, %v2548_v25  ;;  %v2633_v60 = vmul.f32 0.35355338, %v2472_v58 }
 0xb58   :  { %v4371_v61 = vpop.f32.mrf.mxu1  ;;  %v4376_v62 = vpop.f32.mrf.mxu0 }
 0xb59   :  { %v2654_v63 = vsel %vm377_vm4, %v2634_v59, -inf  ;;  %v2651_v1 = vsel %vm377_vm4, %v2633_v60, -inf }
 0xb5a   :  { %2655 = vmax.xlane.f32.xlu0 %v2654_v63  ;;  %2652 = vmax.xlane.f32.xlu1 %v2651_v1  ;;  %v2624_v2 = vpop.f32.mrf.mxu1 }
 0xb5b   :  { %v2635_v3 = vmul.f32 0.35355338, %v2624_v2 }
 0xb5c   :  { %v4381_v4 = vpop.f32.mrf.mxu1 }
 0xb5d   :  { %v2657_v5 = vsel %vm377_vm4, %v2635_v3, -inf }
 0xb5e   :  { %2658 = vmax.xlane.f32.xlu1 %v2657_v5 }
 0xb6f   :  { %2800 = vrot.lane.b32.xlu1 %v5361_v21, %s4913_s11 }
 0xb70   :  { %2724 = vrot.lane.b32.xlu0 %v5357_v18, %s4913_s11 }
 0xb73   :  { %2876 = vrot.lane.b32.xlu1 %v5377_v23, %s4913_s11 }
 0xb74   :  { %2952 = vrot.lane.b32.xlu0 %v5383_v27, %s4913_s11  ;;  %v2638_v7 = vpop.xlane.xlu1 %2637 }
 0xb75   :  { %v2660_v8 = vsub.f32 %v2628_v40, %v2638_v7 }
 0xb77   :  { %3028 = vrot.lane.b32.xlu1 %v5381_v26, %s4913_s11  ;;  %v2668_v12 = vmul.f32 1.442695, %v2660_v8 }
 0xb78   :  { %3104 = vrot.lane.b32.xlu0 %v5391_v29, %s4913_s11  ;;  %v2641_v9 = vpop.xlane.xlu0 %2640 }
 0xb79   :  { %v2661_v13 = vsub.f32 %v2629_v44, %v2641_v9  ;;  %4579 = vpow2.f32 %v2668_v12 }
 0xb7b   :  { %v2670_v14 = vmul.f32 1.442695, %v2661_v13 }
 0xb7d   :  { %4581 = vpow2.f32 %v2670_v14 }
 0xb86   :  { %v5469_v17 = vpop.eup %4579 }
 0xb87   :  { %v2684_v10 = vsel %vm377_vm4, %v5469_v17, 0.0 }
 0xb8a   :  { %v5473_v11 = vpop.eup %4581 }
 0xb8b   :  { %v2687_v18 = vsel %vm377_vm4, %v5473_v11, 0.0 }
 0xb97   :  { %2685 = vadd.xlane.f32.xlu0 %v2684_v10 }
 0xb9b   :  { %2688 = vadd.xlane.f32.xlu1 %v2687_v18 }
 0xbdb   :  { %v2644_v19 = vpop.xlane.xlu0 %2643 }
 0xbdc   :  { %v2662_v20 = vsub.f32 %v2630_v48, %v2644_v19 }
 0xbde   :  { %v2672_v21 = vmul.f32 1.442695, %v2662_v20 }
 0xbdf   :  { %v2650_v22 = vpop.xlane.xlu0 %2649  ;;  %v2647_v23 = vpop.xlane.xlu1 %2646 }
 0xbe0   :  { %4583 = vpow2.f32 %v2672_v21  ;;  %v2664_v26 = vsub.f32 %v2632_v53, %v2650_v22  ;;  %v2663_v27 = vsub.f32 %v2631_v54, %v2647_v23 }
 0xbe2   :  { %v2676_v29 = vmul.f32 1.442695, %v2664_v26  ;;  %v2674_v30 = vmul.f32 1.442695, %v2663_v27  ;;  %v3365_v27 = vld [vmem:[#allocation5 + $0x30] sm:$0xff] }
 0xbe3   :  { %v2656_v32 = vpop.xlane.xlu0 %2655  ;;  %v2653_v33 = vpop.xlane.xlu1 %2652 }
 0xbe4   :  { %4585 = vpow2.f32 %v2676_v29  ;;  %v2666_v34 = vsub.f32 %v2634_v59, %v2656_v32  ;;  %v2665_v35 = vsub.f32 %v2633_v60, %v2653_v33  ;;  %v3366_v29 = vld [vmem:[#allocation5 + $0x38] sm:$0xff] }
 0xbe5   :  { %4587 = vpow2.f32 %v2674_v30  ;;  %v3369_v32 = vpack.c.bf16 %v3366_v29, %v3365_v27 }
 0xbe6   :  { %v2680_v36 = vmul.f32 1.442695, %v2666_v34  ;;  %v2678_v37 = vmul.f32 1.442695, %v2665_v35  ;;  %v3363_v34 = vld [vmem:[#allocation5 + $0x20] sm:$0xff]  ;;  %v3364_v35 = vld [vmem:[#allocation5 + $0x28] sm:$0xff] }
 0xbe7   :  { %v2725_v38 = vpop.permute.xlu0 %2724  ;;  %v2659_v39 = vpop.xlane.xlu1 %2658 }
 0xbe8   :  { %4589 = vpow2.f32 %v2680_v36  ;;  %v2667_v40 = vsub.f32 %v2635_v3, %v2659_v39  ;;  %4383 = vmatpush3.msra.mxu0 %v2725_v38 }
 0xbe9   :  { %4591 = vpow2.f32 %v2678_v37  ;;  %4392 = vmatprep.subr.mxu0 %v4907_v0  ;;  %v3368_v37 = vpack.c.bf16 %v3364_v35, %v3363_v34 }
 0xbea   :  { %v2682_v41 = vmul.f32 1.442695, %v2667_v40 }
 0xbeb   :  { %v2801_v42 = vpop.permute.xlu1 %2800  ;;  %v2953_v55 = vpop.permute.xlu0 %2952 }
 0xbec   :  { %4593 = vpow2.f32 %v2682_v41  ;;  %4388 = vmatpush3.msra.mxu1 %v2801_v42 }
 0xbed   :  { %v4584_v43 = vpop.eup %4583  ;;  %4397 = vmatprep.subr.mxu1 %v4907_v0 }
 0xbee   :  { %v2690_v44 = vsel %vm377_vm4, %v4584_v43, 0.0 }
 0xbef   :  { %2691 = vadd.xlane.f32.xlu0 %v2690_v44  ;;  %v2877_v56 = vpop.permute.xlu1 %2876  ;;  %v3105_v57 = vpop.permute.xlu0 %3104 }
 0xbf1   :  { %v4586_v45 = vpop.eup %4585 }
 0xbf2   :  { %v4588_v46 = vpop.eup %4587  ;;  %v2696_v47 = vsel %vm377_vm4, %v4586_v45, 0.0 }
 0xbf3   :  { %2697 = vadd.xlane.f32.xlu0 %v2696_v47  ;;  %v2693_v48 = vsel %vm377_vm4, %v4588_v46, 0.0  ;;  %v3029_v24 = vpop.permute.xlu1 %3028 }
 0xbf4   :  { %2694 = vadd.xlane.f32.xlu1 %v2693_v48 }
 0xbf5   :  { %v4590_v49 = vpop.eup %4589 }
 0xbf6   :  { %v5482_v50 = vpop.eup %4591  ;;  %v2702_v51 = vsel %vm377_vm4, %v4590_v49, 0.0 }
 0xbf7   :  { %2703 = vadd.xlane.f32.xlu0 %v2702_v51  ;;  %v2699_v52 = vsel %vm377_vm4, %v5482_v50, 0.0 }
 0xbf8   :  { %2700 = vadd.xlane.f32.xlu1 %v2699_v52 }
 0xbf9   :  { %v5487_v53 = vpop.eup %4593 }
 0xbfa   :  { %v2705_v54 = vsel %vm377_vm4, %v5487_v53, 0.0 }
 0xbfc   :  { %2706 = vadd.xlane.f32.xlu1 %v2705_v54 }
 0xc0d   :  { %3180 = vrot.lane.b32.xlu1 %v5389_v28, %s4913_s11  ;;  %3256 = vrot.lane.b32.xlu0 %v5397_v31, %s4913_s11 }
 0xc20   :  { %v2686_v25 = vpop.xlane.xlu0 %2685 }
 0xc21   :  { %4595 = vrcp.f32 %v2686_v25 }
 0xc24   :  { %v2689_v58 = vpop.xlane.xlu1 %2688 }
 0xc25   :  { %4597 = vrcp.f32 %v2689_v58 }
 0xc2e   :  { %v4596_v59 = vpop.eup %4595 }
 0xc2f   :  { %v2716_v60 = vmul.f32 %v4596_v59, %v5469_v17 }
 0xc31   :  { %4385 = vmatmul.mubr.msk.f32.vlgmr.msra.gmra.mxu0 %vm377_vm4, %v2716_v60 }
 0xc32   :  { %v4598_v61 = vpop.eup %4597  ;;  %4393 = vmatpush3.msra.mxu0 %v2877_v56  ;;  %4394 = vmatprep.mubr.msk.f32.mxu0 %vm4908_vm2, %v4907_v0 }
 0xc33   :  { %v2717_v28 = vmul.f32 %v4598_v61, %v5473_v11  ;;  %4402 = vmatprep.subr.mxu0 %v4907_v0 }
 0xc35   :  { %4390 = vmatmul.mubr.msk.f32.vlgmr.msra.gmra.mxu1 %vm377_vm4, %v2717_v28 }
 0xc36   :  { %4398 = vmatpush3.msra.mxu1 %v2953_v55  ;;  %4399 = vmatprep.mubr.msk.f32.mxu1 %vm4908_vm2, %v4907_v0 }
 0xc37   :  { %4407 = vmatprep.subr.mxu1 %v4907_v0 }
 0xc78   :  { %v2692_v31 = vpop.xlane.xlu0 %2691 }
 0xc79   :  { %4599 = vrcp.f32 %v2692_v31 }
 0xc7c   :  { %v2698_v62 = vpop.xlane.xlu0 %2697 }
 0xc7d   :  { %4601 = vrcp.f32 %v2698_v62  ;;  %v2695_v63 = vpop.xlane.xlu1 %2694  ;;  %v3427_v62 = vld [vmem:[#allocation7 + $0x30] sm:$0xff] }
 0xc7e   :  { %4603 = vrcp.f32 %v2695_v63  ;;  %v3428_v63 = vld [vmem:[#allocation7 + $0x38] sm:$0xff] }
 0xc80   :  { %v2704_v1 = vpop.xlane.xlu0 %2703 }
 0xc81   :  { %4605 = vrcp.f32 %v2704_v1  ;;  %v2701_v2 = vpop.xlane.xlu1 %2700  ;;  %v3431_v1 = vpack.c.bf16 %v3428_v63, %v3427_v62 }
 0xc82   :  { %4607 = vrcp.f32 %v2701_v2  ;;  %v3425_v2 = vld [vmem:[#allocation7 + $0x20] sm:$0xff] }
 0xc84   :  { %v3257_v18 = vpop.permute.xlu0 %3256 }
 0xc85   :  { %v2707_v3 = vpop.xlane.xlu1 %2706 }
 0xc86   :  { %v4600_v4 = vpop.eup %4599  ;;  %4609 = vrcp.f32 %v2707_v3  ;;  %v3426_v3 = vld [vmem:[#allocation7 + $0x28] sm:$0xff] }
 0xc87   :  { %v2718_v5 = vmul.f32 %v4600_v4, %v4584_v43  ;;  %v3430_v4 = vpack.c.bf16 %v3426_v3, %v3425_v2 }
 0xc89   :  { %4395 = vmatmul.mubr.msk.f32.vlgmr.msra.gmra.mxu0 %vm377_vm4, %v2718_v5  ;;  %v3181_v13 = vpop.permute.xlu1 %3180  ;;  %v4088_v5 = vld [vmem:[%s5677_s1 + $0x1] ss:$0 sm:$0xff] }
 0xc8a   :  { %v4602_v7 = vpop.eup %4601  ;;  %4403 = vmatpush3.msra.mxu0 %v3029_v24  ;;  %4404 = vmatprep.mubr.msk.f32.mxu0 %vm4908_vm2, %v4907_v0 }
 0xc8b   :  { %v4604_v8 = vpop.eup %4603  ;;  %4412 = vmatprep.subr.mxu0 %v4907_v0  ;;  %v2720_v9 = vmul.f32 %v4602_v7, %v4586_v45 }
 0xc8c   :  { %v2719_v12 = vmul.f32 %v4604_v8, %v4588_v46 }
 0xc8d   :  { %4405 = vmatmul.mubr.msk.f32.vlgmr.msra.gmra.mxu0 %vm377_vm4, %v2720_v9 }
 0xc8e   :  { %v4606_v14 = vpop.eup %4605  ;;  %4400 = vmatmul.mubr.msk.f32.vlgmr.msra.gmra.mxu1 %vm377_vm4, %v2719_v12  ;;  %4413 = vmatpush3.msra.mxu0 %v3181_v13 }
 0xc8f   :  { %v4608_v17 = vpop.eup %4607  ;;  %4408 = vmatpush3.msra.mxu1 %v3105_v57  ;;  %4409 = vmatprep.mubr.msk.f32.mxu1 %vm4908_vm2, %v4907_v0  ;;  %v2722_v10 = vmul.f32 %v4606_v14, %v4590_v49 }
 0xc90   :  { %4414 = vmatprep.mubr.msk.f32.mxu0 %vm4908_vm2, %v4907_v0  ;;  %4417 = vmatprep.subr.mxu1 %v4907_v0  ;;  %v2721_v11 = vmul.f32 %v4608_v17, %v5482_v50 }
 0xc91   :  { %4415 = vmatmul.mubr.msk.f32.vlgmr.msra.gmra.mxu0 %vm377_vm4, %v2722_v10  ;;  %4422 = vmatprep.subr.bf16.mxu0 %v4907_v0 }
 0xc92   :  { %4410 = vmatmul.mubr.msk.f32.vlgmr.msra.gmra.mxu1 %vm377_vm4, %v2721_v11  ;;  %4426 = vmatprep.mubr.msk.bf16.mxu0 %vm4908_vm2, %v4907_v0 }
 0xc93   :  { %v4610_v19 = vpop.eup %4609  ;;  %4418 = vmatpush3.msra.mxu1 %v3257_v18  ;;  %4419 = vmatprep.mubr.msk.f32.mxu1 %vm4908_vm2, %v4907_v0  ;;  %v3489_v18 = vld [vmem:[#allocation8 + $0x30] sm:$0xff] }
 0xc94   :  { %v2723_v20 = vmul.f32 %v4610_v19, %v5487_v53  ;;  %4430 = vmatprep.subr.bf16.mxu1 %v4907_v0  ;;  %4423 = vmatpush3.bf16.msra.mxu0 %v3369_v32  ;;  %v3490_v19 = vld [vmem:[#allocation8 + $0x38] sm:$0xff] }
 0xc95   :  { %4424 = vmatprep.subr.bf16.mxu0 %v4907_v0 }
 0xc96   :  { %4420 = vmatmul.mubr.msk.f32.vlgmr.msra.gmra.mxu1 %vm377_vm4, %v2723_v20  ;;  %v3493_v20 = vpack.c.bf16 %v3490_v19, %v3489_v18  ;;  %v3715_v19 = vld [vmem:[#allocation14 + $0x18] sm:$0xff] }
 0xc97   :  { %4434 = vmatprep.mubr.msk.bf16.mxu1 %vm4908_vm2, %v4907_v0  ;;  %4431 = vmatpush3.bf16.msra.mxu1 %v3431_v1 }
 0xc98   :  { %4425 = vmatpush3.bf16.msra.mxu0 %v3368_v37  ;;  %4432 = vmatprep.subr.bf16.mxu1 %v4907_v0  ;;  %v3599_v37 = vld [vmem:[%s5644_s12 + $0x10] sm:$0xff] }
 0xc99   :  { %4438 = vmatprep.subr.bf16.mxu0 %v4907_v0 }
 0xc9b   :  { %4433 = vmatpush3.bf16.msra.mxu1 %v3430_v4 }
 0xcf1   :  { %v2796_v21 = vpop.f32.mrf.mxu0 }
 0xcf3   :  { %v4386_v22 = vpop.f32.mrf.mxu0 }
 0xcf4   :  { %v3488_v22 = vld [vmem:[#allocation8 + $0x28] sm:$0xff] }
 0xcf5   :  { %v2872_v23 = vpop.f32.mrf.mxu1 }
 0xcf7   :  { %v4391_v26 = vpop.f32.mrf.mxu1 }
 0xd49   :  { %v2948_v30 = vpop.f32.mrf.mxu0 }
 0xd4b   :  { %v4396_v33 = vpop.f32.mrf.mxu0 }
 0xd4d   :  { %v3100_v36 = vpop.f32.mrf.mxu0 }
 0xd4e   :  { %v3024_v38 = vpop.f32.mrf.mxu1 }
 0xd4f   :  { %v4530_v39 = vpack.i.bf16 %v3024_v38, %v2948_v30  ;;  %v4406_v40 = vpop.f32.mrf.mxu0  ;;  %v3598_v38 = vld [vmem:[%s5644_s12 + $0x8] sm:$0xff] }
 0xd50   :  { %v4401_v41 = vpop.f32.mrf.mxu1  ;;  %v4093_v40 = vld [vmem:[#allocation10 + $0x1] ss:$0 sm:$0xff] }
 0xd51   :  { %4531 = vrot.lane.b32.xlu1 %v4530_v39, %s4896_s29  ;;  %v3252_v42 = vpop.f32.mrf.mxu0  ;;  %v3597_v39 = vld [vmem:[%s5644_s12] sm:$0xff] }
 0xd52   :  { %v3176_v43 = vpop.f32.mrf.mxu1 }
 0xd53   :  { %v4535_v44 = vpack.i.bf16 %v3176_v43, %v3100_v36  ;;  %v4416_v45 = vpop.f32.mrf.mxu0  ;;  %v3600_v36 = vld [vmem:[%s5644_s12 + $0x18] sm:$0xff] }
 0xd54   :  { %v4411_v46 = vpop.f32.mrf.mxu1  ;;  %4446 = vmatprep.subr.mxu1 %v3600_v36 }
 0xd55   :  { %4536 = vrot.lane.b32.xlu0 %v4535_v44, %s4899_s0  ;;  %s4915_s0 = smov [#allocation19]  }
 0xd56   :  { %v3328_v47 = vpop.f32.mrf.mxu1 }
 0xd57   :  { %v4540_v48 = vpack.i.bf16 %v3328_v47, %v3252_v42 }
 0xd58   :  { %v4421_v49 = vpop.f32.mrf.mxu1 }
 0xd59   :  { %4541 = vrot.lane.b32.xlu1 %v4540_v48, %s4914_s7 }
 0xdc3   :  { %v4532_v50 = vpop.permute.xlu1 %4531 }
 0xdc4   :  { %v4534_v52 = vunpack.i.h.bf16 %v4532_v50  ;;  %v4533_v53 = vunpack.i.l.bf16 %v4532_v50 }
 0xdc6   :  { %v3357_v57 = vsel %vm377_vm4, %v2872_v23, %v4534_v52  ;;  %v3356_v24 = vsel %vm377_vm4, %v2796_v21, %v4533_v53  ;;  %v3487_v21 = vld [vmem:[#allocation8 + $0x20] sm:$0xff] }
 0xdc7   :  { %v4537_v51 = vpop.permute.xlu0 %4536  ;;  %v3492_v23 = vpack.c.bf16 %v3488_v22, %v3487_v21  ;;  %v3714_v21 = vld [vmem:[#allocation14 + $0x10] sm:$0xff] }
 0xdc8   :  { %v4539_v54 = vunpack.i.h.bf16 %v4537_v51  ;;  %v4538_v55 = vunpack.i.l.bf16 %v4537_v51  ;;  %v3801_v22 = vld [vmem:[#allocation16 + $0x10] sm:$0xff] }
 0xdca   :  { %v3359_v59 = vsel %vm1714_vm5, %v3357_v57, %v4539_v54  ;;  %v3358_v60 = vsel %vm1714_vm5, %v3356_v24, %v4538_v55 }
 0xdcb   :  { %v4542_v56 = vpop.permute.xlu1 %4541 }
 0xdcc   :  { %v4544_v25 = vunpack.i.h.bf16 %v4542_v56  ;;  %v4543_v58 = vunpack.i.l.bf16 %v4542_v56 }
 0xdce   :  { %v3361_v61 = vsel %vm1717_vm6, %v3359_v59, %v4544_v25  ;;  %v3360_v28 = vsel %vm1717_vm6, %v3358_v60, %v4543_v58 }
 0xdcf   :  { %v3367_v31 = vpack.c.bf16 %v3361_v61, %v3360_v28 }
 0xdd1   :  { %4427 = vmatmul.mubr.msk.bf16.vlgmr.msra.gmra.mxu0 %vm316_vm3, %v3367_v31 }
 0xdd2   :  { %4442 = vmatprep.mubr.msk.bf16.mxu0 %vm4908_vm2, %v4907_v0  ;;  %4439 = vmatpush3.bf16.msra.mxu0 %v3493_v20  ;;  %v3802_v20 = vld [vmem:[#allocation16 + $0x18] sm:$0xff] }
 0xdd3   :  { %4440 = vmatprep.subr.bf16.mxu0 %v4907_v0 }
 0xdd6   :  { %4441 = vmatpush3.bf16.msra.mxu0 %v3492_v23  ;;  %v3713_v23 = vld [vmem:[#allocation14 + $0x8] sm:$0xff] }
 0xdd7   :  { %4457 = vmatprep.subr.mxu0 %v4907_v0 }
 0xe91   :  { %v3415_v7 = vpop.f32.mrf.mxu0 }
 0xe92   :  { %v3416_v9 = vadd.f32 %v4088_v5, %v3415_v7 }
 0xe93   :  { %v4428_v8 = vpop.f32.mrf.mxu0 }
 0xe94   :  { %v3422_v17 = vadd.f32 %v3416_v9, %v5345_v15  ;;  %v4091_v15 = vld [vmem:[%s5678_s30 + $0x1] ss:$0 sm:$0xff]  ;;  %v3573_v8 = vld [vmem:[#allocation11 + $0x1] sm:$0x1] }
 0xe95   :  { %v3418_v12 = vpop.f32.mrf.mxu0 }
 0xe96   :  { %v3419_v13 = vadd.f32 %v4088_v5, %v3418_v12 }
 0xe97   :  { %v4429_v14 = vpop.f32.mrf.mxu0 }
 0xe98   :  { %v3423_v10 = vadd.f32 %v3419_v13, %v5347_v16  ;;  %v4095_v14 = vld [vmem:[#allocation13 + $0x1] ss:$0 sm:$0xff] }
 0xe9a   :  { %v3429_v11 = vpack.c.bf16 %v3423_v10, %v3422_v17 }
 0xe9c   :  { %4435 = vmatmul.mubr.msk.bf16.vlgmr.msra.gmra.mxu1 %vm316_vm3, %v3429_v11 }
 0xe9d   :  { %4447 = vmatpush3.msra.mxu1 %v3600_v36 }
 0xe9e   :  { %4448 = vmatprep.subr.mxu1 %v3599_v37 }
 0xe9f   :  { %4449 = vmatpush3.msra.mxu1 %v3599_v37 }
 0xea0   :  { %4450 = vmatprep.subr.mxu1 %v3598_v38 }
 0xea1   :  { %4451 = vmatpush3.msra.mxu1 %v3598_v38 }
 0xea2   :  { %4452 = vmatprep.subr.mxu1 %v3597_v39 }
 0xea3   :  { %4453 = vmatpush3.msra.mxu1 %v3597_v39 }
 0xea4   :  { %4468 = vmatprep.subr.mxu1 %v4907_v0 }
 0xf5c   :  { %v3477_v16 = vpop.f32.mrf.mxu1 }
 0xf5d   :  { %v3478_v27 = vadd.f32 %v4091_v15, %v3477_v16  ;;  %v3712_v16 = vld [vmem:[#allocation14] sm:$0xff] }
 0xf5e   :  { %v4436_v26 = vpop.f32.mrf.mxu1 }
 0xf5f   :  { %v3484_v33 = vmax.f32 %v3478_v27, 0.0  ;;  %v3799_v26 = vld [vmem:[#allocation16] sm:$0xff]  ;;  %v3798_v27 = vld [vmem:[%s5649_s17] sm:$0x1] }
 0xf60   :  { %v3480_v29 = vpop.f32.mrf.mxu1 }
 0xf61   :  { %v3481_v30 = vadd.f32 %v4091_v15, %v3480_v29  ;;  %v3800_v15 = vld [vmem:[#allocation16 + $0x8] sm:$0xff]  ;;  %v4096_v29 = vld [vmem:[%s5645_s13] ss:$0 sm:$0xff] }
 0xf62   :  { %v4437_v32 = vpop.f32.mrf.mxu1 }
 0xf63   :  { %v3485_v34 = vmax.f32 %v3481_v30, 0.0 }
 0xf65   :  { %v3491_v35 = vpack.c.bf16 %v3485_v34, %v3484_v33 }
 0xf67   :  { %4443 = vmatmul.mubr.msk.bf16.vlgmr.msra.gmra.mxu0 %vm316_vm3, %v3491_v35 }
 0xf68   :  { %4465 = vmatprep.mubr.msk.f32.mxu0 %vm4908_vm2, %v4907_v0  ;;  %4458 = vmatpush3.msra.mxu0 %v3715_v19 }
 0xf69   :  { %4459 = vmatprep.subr.mxu0 %v4907_v0 }
 0xf6a   :  { %4460 = vmatpush3.msra.mxu0 %v3714_v21 }
 0xf6b   :  { %4461 = vmatprep.subr.mxu0 %v4907_v0 }
 0xf6c   :  { %4462 = vmatpush3.msra.mxu0 %v3713_v23 }
 0xf6d   :  { %4463 = vmatprep.subr.mxu0 %v4907_v0 }
 0xf6e   :  { %4464 = vmatpush3.msra.mxu0 %v3712_v16 }
 0xf6f   :  { %4479 = vmatprep.subr.mxu0 %v4907_v0 }
0x1027   :  { %v3539_v41 = vpop.f32.mrf.mxu0 }
0x1028   :  { %v3540_v42 = vadd.f32 %v4093_v40, %v3539_v41 }
0x1029   :  { %v4444_v43 = vpop.f32.mrf.mxu0 }
0x102a   :  { %v3546_v45 = vadd.f32 %v3540_v42, %v3422_v17 }
0x102b   :  { %v3542_v44 = vpop.f32.mrf.mxu0 }
0x102c   :  { %v3543_v46 = vadd.f32 %v4093_v40, %v3542_v44  ;;  %v3548_v49 = vsel %vm316_vm3, %v3546_v45, 0.0 }
0x102d   :  { %v4445_v47 = vpop.f32.mrf.mxu0 }
0x102e   :  { %v3547_v48 = vadd.f32 %v3543_v46, %v3423_v10 }
0x1030   :  { %v3549_v50 = vsel %vm316_vm3, %v3547_v48, 0.0 }
0x1031   :  { %v3550_v51 = vadd.f32 %v3549_v50, %v3548_v49 }
0x1033   :  { %v3551_v52 = vrot.slane %v3550_v51, 4 }
0x1035   :  { %v3552_v53 = vadd.f32 %v3551_v52, %v3550_v51 }
0x1037   :  { %v3553_v54 = vrot.slane %v3552_v53, 2 }
0x1039   :  { %v3554_v55 = vadd.f32 %v3553_v54, %v3552_v53  ;;  %v3893_v54 = vld [vmem:[#allocation17 + $0x18] sm:$0xff] }
0x103b   :  { %v3555_v56 = vrot.slane %v3554_v55, 1 }
0x103d   :  { %v3556_v57 = vadd.f32 %v3555_v56, %v3554_v55  ;;  %v3892_v56 = vld [vmem:[#allocation17 + $0x10] sm:$0xff] }
0x103f   :  { %v3557_v24 = vmul.f32 0.0625, %v3556_v57  ;;  %v3891_v57 = vld [vmem:[#allocation17 + $0x8] sm:$0xff] }
0x1041   :  { %v3558_v25 = vsub.f32 %v3546_v45, %v3557_v24  ;;  %v3559_v58 = vsub.f32 %v3547_v48, %v3557_v24  ;;  %v3890_v24 = vld [vmem:[#allocation17] sm:$0xff] }
0x1043   :  { %v3560_v59 = vmul.f32 %v3558_v25, %v3558_v25  ;;  %v3561_v60 = vmul.f32 %v3559_v58, %v3559_v58 }
0x1045   :  { %v3562_v61 = vsel %vm316_vm3, %v3560_v59, 0.0  ;;  %v3563_v28 = vsel %vm316_vm3, %v3561_v60, 0.0  ;;  %v4099_v59 = vld [vmem:[%s5648_s16] ss:$0 sm:$0xff] }
0x1046   :  { %v3564_v31 = vadd.f32 %v3563_v28, %v3562_v61  ;;  %v4102_v61 = vld [vmem:[%s5646_s14] ss:$0 sm:$0xff] }
0x1048   :  { %v3565_v62 = vrot.slane %v3564_v31, 4 }
0x104a   :  { %v3566_v63 = vadd.f32 %v3565_v62, %v3564_v31 }
0x104c   :  { %v3567_v1 = vrot.slane %v3566_v63, 2 }
0x104e   :  { %v3568_v2 = vadd.f32 %v3567_v1, %v3566_v63 }
0x1050   :  { %v3569_v3 = vrot.slane %v3568_v2, 1 }
0x1052   :  { %v3570_v4 = vadd.f32 %v3569_v3, %v3568_v2 }
0x1054   :  { %v3571_v5 = vmul.f32 0.0625, %v3570_v4 }
0x1056   :  { %v3574_v7 = vadd.f32 1e-05, %v3571_v5 }
0x1058   :  { %4611 = vrsqrt.f32 %v3574_v7 }
0x1065   :  { %v4612_v9 = vpop.eup %4611 }
0x1066   :  { %v3576_v12 = vmul.f32 %v4612_v9, %v3573_v8 }
0x1068   :  { %v3581_v13 = vrot.slane %v3576_v12, %v5342_v6 }
0x106a   :  { %v3584_v17 = vmul.f32 %v3581_v13, %v3559_v58  ;;  %v3583_v10 = vmul.f32 %v3581_v13, %v3558_v25  ;;  %v3803_v25 = vld [vmem:[%s5651_s19] sm:$0x1]  ;;  %s3980_s19 = sshll.u32 %s4915_s0, 4  ;;  %s3981_s19 = int_to_ptr.vmem [resolvable:$true] %s3980_s19 }
0x106b   :  { %s4817_s15 = scalar_lea.vmem %s3981_s19, 256  ;;  %p4822_p9 = scmp.lt.s32.totalorder %s3981_s19, %s3981_s19 }
0x106c   :  { %v3594_v11 = vadd.f32 %v4095_v14, %v3584_v17  ;;  %v3593_v18 = vadd.f32 %v4095_v14, %v3583_v10  ;;  %p4818_p8 = scmp.ne.s32.totalorder %s3981_s19, %s4817_s15  ;;  %p4823_p10 = scmp.lt.s32.totalorder %s4817_s15, %s4817_s15 }
0x106e   :  { %3596 = vst.msk [vmem:[#allocation19 + $0x8] sm:$0xff] %vm316_vm3, %v3594_v11  ;;  %4454 = vmatprep.mubr.msk.f32.mxu1 %vm316_vm3, %v3593_v18  ;;  %3595 = vst.msk [vmem:[#allocation19] sm:$0xff] %vm316_vm3, %v3593_v18  ;;  %p4824_p11 = por %p4823_p10, %p4822_p9 }
0x106f   :  { %4455 = vmatmul.mubr.msk.f32.vlgmr.msra.gmra.mxu1 %vm316_vm3, %v3594_v11 }
0x1070   :  { %4476 = vmatprep.mubr.msk.f32.mxu1 %vm4908_vm2, %v4907_v0  ;;  %4469 = vmatpush3.msra.mxu1 %v3802_v20  ;;  %p4825_p12 = pnand %p4824_p11, %p4818_p8 }
0x1071   :  { %4470 = vmatprep.subr.mxu1 %v4907_v0 }
0x1072   :  { %4471 = vmatpush3.msra.mxu1 %v3801_v22 }
0x1073   :  { %4472 = vmatprep.subr.mxu1 %v4907_v0 }
0x1074   :  { %4473 = vmatpush3.msra.mxu1 %v3800_v15 }
0x1075   :  { %4474 = vmatprep.subr.mxu1 %v4907_v0 }
0x1076   :  { %4475 = vmatpush3.msra.mxu1 %v3799_v26 }
0x1077   :  { %4477 = vmatmul.mubr.msk.f32.vlgmr.msra.gmra.mxu1 %vm316_vm3, %v3798_v27 }
0x112f   :  { %v4456_v30 = vpop.f32.mrf.mxu1 }
0x1130   :  { %v3686_v32 = vadd.f32 %v4456_v30, %v4096_v29 }
0x1131   :  { %v3680_v33 = vpop.f32.mrf.mxu1 }
0x1132   :  { %v3696_v34 = vsel %vm316_vm3, %v3686_v32, 0.0  ;;  %v3681_v35 = vadd.f32 %v4096_v29, %v3680_v33 }
0x1133   :  { %v3697_v36 = vrot.slane %v3696_v34, 4 }
0x1134   :  { %v3689_v37 = vsel %vm316_vm3, %v3681_v35, 0.0 }
0x1135   :  { %v3698_v38 = vadd.f32 %v3697_v36, %v3696_v34  ;;  %v3690_v39 = vrot.slane %v3689_v37, 4 }
0x1137   :  { %v3699_v40 = vrot.slane %v3698_v38, 2  ;;  %v3691_v41 = vadd.f32 %v3690_v39, %v3689_v37  ;;  %v3873_v53 = vpop.f32.mrf.mxu1 }
0x1138   :  { %v3874_v58 = vadd.f32 %v3873_v53, %v3803_v25 }
0x1139   :  { %v3700_v42 = vadd.f32 %v3699_v40, %v3698_v38  ;;  %v3692_v43 = vrot.slane %v3691_v41, 2  ;;  %v4478_v55 = vpop.f32.mrf.mxu1 }
0x113a   :  { %v3888_v31 = vrot.slane %v3874_v58, %v5342_v6 }
0x113b   :  { %v3701_v44 = vrot.slane %v3700_v42, 1  ;;  %v3693_v45 = vadd.f32 %v3692_v43, %v3691_v41 }
0x113d   :  { %v3702_v46 = vadd.f32 %v3701_v44, %v3700_v42  ;;  %v3694_v47 = vrot.slane %v3693_v45, 1 }
0x113f   :  { %v3695_v48 = vadd.f32 %v3694_v47, %v3693_v45  ;;  %4613 = vtanh.f32 %v3702_v46 }
0x1141   :  { %4615 = vtanh.f32 %v3695_v48  ;;  %v3706_v49 = vsel %vm3705_vm7, %v3702_v46, %v3695_v48 }
0x1142   :  { %3709 = vst.msk [vmem:[#allocation22] sm:$0x3] %vm3708_vm8, %v3706_v49 }
0x114c   :  { %v4614_v50 = vpop.eup %4613 }
0x114e   :  { %v4616_v51 = vpop.eup %4615 }
0x114f   :  { %v3725_v52 = vsel %vm3705_vm7, %v4614_v50, %v4616_v51 }
0x1150   :  { %4466 = vmatmul.mubr.msk.f32.vlgmr.msra.gmra.mxu0 %vm316_vm3, %v3725_v52 }
0x1151   :  { %4487 = vmatprep.mubr.msk.f32.mxu0 %vm4908_vm2, %v4907_v0  ;;  %4480 = vmatpush3.msra.mxu0 %v3893_v54 }
0x1152   :  { %4481 = vmatprep.subr.mxu0 %v4907_v0 }
0x1153   :  { %4482 = vmatpush3.msra.mxu0 %v3892_v56 }
0x1154   :  { %4483 = vmatprep.subr.mxu0 %v4907_v0 }
0x1155   :  { %4484 = vmatpush3.msra.mxu0 %v3891_v57 }
0x1156   :  { %4485 = vmatprep.subr.mxu0 %v4907_v0 }
0x1157   :  { %4486 = vmatpush3.msra.mxu0 %v3890_v24 }
0x1210   :  { %v3794_v60 = vpop.f32.mrf.mxu0 }
0x1211   :  { %v3795_v28 = vadd.f32 %v4099_v59, %v3794_v60 }
0x1212   :  { %v4467_v62 = vpop.f32.mrf.mxu0 }
0x1213   :  { %v3884_v0 = vadd.f32 %v4102_v61, %v3795_v28 }
0x1215   :  { %v3889_v63 = vadd.f32 %v3888_v31, %v3884_v0 }
0x1217   :  { %4488 = vmatmul.mubr.msk.f32.vlgmr.msra.gmra.mxu0 %vm316_vm3, %v3889_v63 }
0x1218   :  { %4828 = shalt.err (!%p4825_p12)
}
0x1219   :  { %3986 = dma.vmem_to_hbm [thread:$0]  %s3981_s19, 256, %s5654_s22, [#allocation4], %s4895_s2, %s4895_s2, %s4896_s29  }
0x121a   :  { %v4103_v6 = vld [vmem:[%s5653_s21] ss:$0 sm:$0xff]  ;;  %s4916_s25 = smov [#allocation20]   ;;  %s4917_s9 = smov [#allocation22]  }
0x121b   :  { %s3993_s8 = sshll.u32 %s4916_s25, 4  ;;  %s4003_s4 = sshll.u32 %s4917_s9, 4  ;;  %s3994_s8 = int_to_ptr.vmem [resolvable:$true] %s3993_s8  ;;  %s4004_s4 = int_to_ptr.vmem [resolvable:$true] %s4003_s4 }
0x121c   :  { %s4837_s27 = scalar_lea.vmem %s3994_s8, 32  ;;  %p4842_p0 = scmp.lt.s32.totalorder %s3994_s8, %s3994_s8 }
0x121d   :  { %p4838_p13 = scmp.ne.s32.totalorder %s3994_s8, %s4837_s27  ;;  %p4843_p1 = scmp.lt.s32.totalorder %s4837_s27, %s4837_s27 }
0x121f   :  { %p4844_p2 = por %p4843_p1, %p4842_p0 }
0x1221   :  { %p4845_p3 = pnand %p4844_p2, %p4838_p13 }
0x12d7   :  { %v3970_v1 = vpop.f32.mrf.mxu0 }
0x12d8   :  { %v3971_v2 = vadd.f32 %v4103_v6, %v3970_v1 }
0x12d9   :  { %v4489_v3 = vpop.f32.mrf.mxu0 }
0x12da   :  { %3974 = vst.msk [vmem:[#allocation20] sm:$0x3] %vm3708_vm8, %v3971_v2 }
0x12db   :  { %4848 = shalt.err (!%p4845_p3)
}
0x12dc   :  { %3996 = dma.vmem_to_hbm [thread:$0]  %s3994_s8, 32, %s5655_s23, [#allocation21]  }
0x12dd   :  { %s4857_s2 = scalar_lea.vmem %s4004_s4, 32  ;;  %p4862_p5 = scmp.lt.s32.totalorder %s4004_s4, %s4004_s4 }
0x12de   :  { %p4858_p4 = scmp.ne.s32.totalorder %s4004_s4, %s4857_s2  ;;  %p4863_p6 = scmp.lt.s32.totalorder %s4857_s2, %s4857_s2 }
0x12e0   :  { %p4864_p7 = por %p4863_p6, %p4862_p5 }
0x12e2   :  { %p4865_p8 = pnand %p4864_p7, %p4858_p4 }
0x12e4   :  { %4868 = shalt.err (!%p4865_p8)
}
0x12e5   :  { %4006 = dma.vmem_to_hbm [thread:$0]  %s4004_s4, 32, %s5656_s24, [#allocation21]  }
0x12e6   :  { %4889 = dma.done.wait [#allocation4], 256  }
0x12e7   :  { %4890 = vsyncadd [#allocation4], 4294967040 }
0x12e8   :  { %4891 = dma.done.wait [#allocation21], 64  }
0x12e9   :  { %4892 = vsyncadd [#allocation21], 4294967232 }
0x12ea   :  { %4016 = vsyncpa [#allocation3], 1 }
0x12eb   :  { %4017 = vsyncpa [#allocation6], 1 }
0x12ec   :  { %4018 = vsyncpa [#allocation9], 1 }
0x12ed   :  { %4019 = vsyncpa [#allocation12], 1 }
0x12ee   :  { %4020 = vsyncpa [#allocation15], 1 }
0x12ef   :  { %4021 = vsyncpa [#allocation18], 1 }
0x12f0   :  { %4022 = vsyncpa [#allocation4], 1 }
0x12f1   :  { %4023 = vsyncpa [#allocation21], 1 }

</bundles_post_ra>
